<compile_context>
chip_gen: v7x
topology: tpu7x:2x2x1
jax: 0.10.0
libtpu: 0.0.40
codegen_flags: <defaults>
</compile_context>

<pallas_src>
import functools

import jax
import jax.numpy as jnp
from jax.experimental import pallas as pl
from jax.experimental.pallas import tpu as pltpu


def _pad_to_32(n):
    """Smallest multiple of 32 >= n, so that 4*n_pad is a multiple of 128 lanes."""
    return -(-n // 32) * 32


# ---------------------------------------------------------------------------
# Kernel
# ---------------------------------------------------------------------------
def _make_kernel(n_layers, n_features):
    L = n_layers
    F = n_features

    def kernel(x_ref,
               enc_wih0_ref, enc_wih_ref, enc_whh_ref, enc_b_ref,
               dec_wih0_ref, dec_wih_ref, dec_b_ref,
               out_ref):
        S = x_ref.shape[0]
        Hp = enc_whh_ref.shape[1]        # padded encoder hidden (4*Hp % 128 == 0)
        Fp = dec_b_ref.shape[-1] // 4    # padded decoder hidden (4*Fp % 128 == 0)
        f32 = jnp.float32

        def lstm_cell(gates, c_prev, hid):
            # gate lane order [i | f | o | g]: only the g extraction (one lane
            # rotate) is on the dependency chain; the f/o rotates + sigmoids
            # hide under the tanh(g) path.
            sig = jax.nn.sigmoid(gates[:, :3 * hid])
            g = jnp.tanh(gates[:, 3 * hid:])
            i = sig[:, :hid]
            f = sig[:, hid:2 * hid]
            o = sig[:, 2 * hid:3 * hid]
            c = f * c_prev + i * g
            return o * jnp.tanh(c), c

        # ---------------- Encoder: wavefront over (layer, time) ---------------
        # Load each layer's weights/bias once (tiny; reused by every cell).
        whh = [enc_whh_ref[l] for l in range(L)]                  # (Hp, 4Hp)
        wih = [None] + [enc_wih_ref[l - 1] for l in range(1, L)]  # (Hp, 4Hp)
        b = [enc_b_ref[l] for l in range(L)]                      # (1, 4Hp)

        # Hoisted layer-0 input projection (+ bias): one matmul, off the chain.
        gx0 = jnp.dot(x_ref[...], enc_wih0_ref[...],
                      preferred_element_type=f32) + b[0]          # (S, 4Hp)

        zeros = jnp.zeros((1, Hp), f32)
        h_st = [zeros] * L
        c_st = [zeros] * L

        for d in range(S + L - 1):                 # diagonals, fully unrolled
            prev_h = list(h_st)                    # values from diagonal d-1
            for l in range(max(0, d - S + 1), min(L, d + 1)):
                t = d - l
                if l == 0:
                    gates = gx0[t:t + 1, :] + jnp.dot(
                        prev_h[0], whh[0], preferred_element_type=f32)
                else:
                    # two independent matmuls; both operands are diagonal-(d-1)
                    # values, so neither extends the serial chain.
                    gates = (jnp.dot(prev_h[l - 1], wih[l],
                                     preferred_element_type=f32)
                             + jnp.dot(prev_h[l], whh[l],
                                       preferred_element_type=f32)
                             + b[l])
                h_st[l], c_st[l] = lstm_cell(gates, c_st[l], Hp)

        h_enc = h_st[L - 1]          # final hidden of the LAST encoder layer

        # ---------------- Decoder: L stacked layers, a single timestep --------
        # Zero initial state  =>  h0 @ W_hh == 0 (decoder W_hh never needed) and
        #                         c_new = f*0 + i*g = i*g.
        inp = h_enc
        for l in range(L):
            w = dec_wih0_ref[...] if l == 0 else dec_wih_ref[l - 1]
            gates = jnp.dot(inp, w, preferred_element_type=f32) + dec_b_ref[l]
            sig = jax.nn.sigmoid(gates[:, :3 * Fp])
            g = jnp.tanh(gates[:, 3 * Fp:])
            i = sig[:, :Fp]
            o = sig[:, 2 * Fp:3 * Fp]
            inp = o * jnp.tanh(i * g)

        # x_hat: keep the F real lanes of the padded decoder width.
        # (flip over the length-1 time axis is a no-op)
        out_ref[...] = inp[:, :F]

    return kernel


# ---------------------------------------------------------------------------
# Wrapper
# ---------------------------------------------------------------------------
def lstm_autoencoder_forward(x, kparams, n_layers, n_features):
    S, F = x.shape
    assert F == n_features
    kernel = _make_kernel(n_layers, n_features)
    return pl.pallas_call(
        kernel,
        out_shape=jax.ShapeDtypeStruct((1, n_features), jnp.float32),
        in_specs=[pl.BlockSpec(memory_space=pltpu.MemorySpace.VMEM)] * 8,
        out_specs=pl.BlockSpec(memory_space=pltpu.MemorySpace.VMEM),
    )(x,
      kparams["enc_wih0"], kparams["enc_wih"], kparams["enc_whh"], kparams["enc_b"],
      kparams["dec_wih0"], kparams["dec_wih"], kparams["dec_b"])


# ---------------------------------------------------------------------------
# Parameters (PyTorch layout) + one-time kernel-layout preparation
# ---------------------------------------------------------------------------
def init_params(key, n_features, hidden_size, n_layers):
    """Deterministic synthetic params, PyTorch-LSTM-like uniform init.
    Stored pre-transposed (x @ W) in PyTorch gate order [i, f, g, o]."""
    F, H, L = n_features, hidden_size, n_layers
    ks = list(jax.random.split(key, 8))

    def u(k, shape, bound):
        return jax.random.uniform(k, shape, jnp.float32, -bound, bound)

    ke = 1.0 / float(H) ** 0.5
    kd = 1.0 / float(F) ** 0.5
    # TODO(synk): enc_b / dec_b model b_ih + b_hh as one uniform draw (not the
    # sum of two draws); fine for synthetic params, not a checkpoint import.
    return dict(
        enc_wih0=u(ks[0], (F, 4 * H), ke),          # layer-0 input weights
        enc_wih=u(ks[1], (L - 1, H, 4 * H), ke),    # layers 1..L-1 input weights
        enc_whh=u(ks[2], (L, H, 4 * H), ke),        # recurrent weights
        enc_b=u(ks[3], (L, 1, 4 * H), ke),          # b_ih + b_hh combined
        dec_wih0=u(ks[4], (H, 4 * F), kd),
        dec_wih=u(ks[5], (L - 1, F, 4 * F), kd),
        dec_whh=u(ks[6], (L, F, 4 * F), kd),        # reference only (unused: 1 step, zero h0)
        dec_b=u(ks[7], (L, 1, 4 * F), kd),
    )


def _reorder_ifgo_to_ifog(w):
    """Permute last axis from PyTorch's [i, f, g, o] to [i, f, o, g]."""
    i_, f_, g_, o_ = jnp.split(w, 4, axis=-1)
    return jnp.concatenate([i_, f_, o_, g_], axis=-1)


def _pad_gate_cols(w, hid, hid_pad):
    """Zero-pad each of the 4 gate blocks on the last axis from hid to hid_pad."""
    if hid_pad == hid:
        return w
    parts = jnp.split(w, 4, axis=-1)
    pad = [(0, 0)] * (w.ndim - 1) + [(0, hid_pad - hid)]
    return jnp.concatenate([jnp.pad(p, pad) for p in parts], axis=-1)


def prepare_kernel_params(params, n_features, n_layers):
    """One-time layout plumbing (plain JAX, outside the kernel):
      * gate columns reordered [i,f,g,o] -> [i,f,o,g],
      * encoder and decoder gate widths zero-padded so 4*H_pad / 4*F_pad are
        multiples of 128 lanes (padded lanes stay exactly zero through the net),
      * contraction rows zero-padded to match the padded hidden widths,
      * decoder W_hh dropped (single step from zero state never uses it),
      * n_layers == 1 guarded with never-read dummy stacks (zero-sized operands
        do not lower)."""
    F, L = n_features, n_layers
    H = params["enc_whh"].shape[-2]
    Hp = _pad_to_32(H)
    Fp = _pad_to_32(F)

    def prep(w, hid, hid_pad, rows=None, rows_pad=None):
        w = _reorder_ifgo_to_ifog(w)
        w = _pad_gate_cols(w, hid, hid_pad)
        if rows is not None and rows_pad != rows:
            pad = [(0, 0)] * (w.ndim - 2) + [(0, rows_pad - rows), (0, 0)]
            w = jnp.pad(w, pad)
        return w

    out = {
        "enc_wih0": prep(params["enc_wih0"], H, Hp),             # (F, 4Hp)
        "enc_whh": prep(params["enc_whh"], H, Hp, H, Hp),        # (L, Hp, 4Hp)
        "enc_b": prep(params["enc_b"], H, Hp),                   # (L, 1, 4Hp)
        "dec_wih0": prep(params["dec_wih0"], F, Fp, H, Hp),      # (Hp, 4Fp)
        "dec_b": prep(params["dec_b"], F, Fp),                   # (L, 1, 4Fp)
    }
    if L > 1:
        out["enc_wih"] = prep(params["enc_wih"], H, Hp, H, Hp)   # (L-1, Hp, 4Hp)
        out["dec_wih"] = prep(params["dec_wih"], F, Fp, F, Fp)   # (L-1, Fp, 4Fp)
    else:
        out["enc_wih"] = jnp.zeros((1, Hp, 4 * Hp), jnp.float32)
        out["dec_wih"] = jnp.zeros((1, Fp, 4 * Fp), jnp.float32)
    return out


# ---------------------------------------------------------------------------
# Pure-JAX reference (PyTorch gate order, unpadded) for the correctness check
# ---------------------------------------------------------------------------
def _lstm_cell_ref(x_t, h, c, wih, whh, b):
    hid = whh.shape[0]
    gates = x_t @ wih + h @ whh + b
    i = jax.nn.sigmoid(gates[:, 0 * hid:1 * hid])
    f = jax.nn.sigmoid(gates[:, 1 * hid:2 * hid])
    g = jnp.tanh(gates[:, 2 * hid:3 * hid])
    o = jax.nn.sigmoid(gates[:, 3 * hid:4 * hid])
    c_new = f * c + i * g
    return o * jnp.tanh(c_new), c_new


def ref_forward(x, params, n_layers):
    L = n_layers
    H = params["enc_whh"].shape[1]
    F = params["dec_whh"].shape[1]
    S = x.shape[0]

    def run_layer(seq, wih, whh, b, hid):
        h = jnp.zeros((1, hid), jnp.float32)
        c = jnp.zeros((1, hid), jnp.float32)
        outs = []
        for t in range(S):
            h, c = _lstm_cell_ref(seq[t:t + 1, :], h, c, wih, whh, b)
            outs.append(h)
        return jnp.concatenate(outs, axis=0), h

    seq, h_enc = run_layer(x, params["enc_wih0"], params["enc_whh"][0],
                           params["enc_b"][0], H)
    for l in range(1, L):
        seq, h_enc = run_layer(seq, params["enc_wih"][l - 1], params["enc_whh"][l],
                               params["enc_b"][l], H)

    hd, _ = _lstm_cell_ref(h_enc, jnp.zeros((1, F)), jnp.zeros((1, F)),
                           params["dec_wih0"], params["dec_whh"][0],
                           params["dec_b"][0])
    for l in range(1, L):
        hd, _ = _lstm_cell_ref(hd, jnp.zeros((1, F)), jnp.zeros((1, F)),
                               params["dec_wih"][l - 1], params["dec_whh"][l],
                               params["dec_b"][l])
    return hd


if __name__ == "__main__":
    # Small, module-consistent shapes.
    n_features = 8
    hidden_size = 32
    n_layers = 3
    seq_len = 8

    key = jax.random.PRNGKey(0)
    kx, kp = jax.random.split(key)
    # x: (seq_len, n_features) — time-major, unbatched (batch_first=False)
    x = jax.random.normal(kx, (seq_len, n_features), jnp.float32)
    params = init_params(kp, n_features, hidden_size, n_layers)

    # One-time layout prep (gate reorder + lane padding), then run.
    kparams = prepare_kernel_params(params, n_features, n_layers)
    fwd = jax.jit(functools.partial(lstm_autoencoder_forward,
                                    n_layers=n_layers, n_features=n_features))
    x_hat = jax.block_until_ready(fwd(x, kparams))

    x_hat_ref = ref_forward(x, params, n_layers)
    assert x_hat.shape == (1, n_features)
    assert jnp.allclose(x_hat, x_hat_ref, rtol=1e-4, atol=1e-4), (
        f"mismatch: {x_hat} vs {x_hat_ref}")

    print("KERNEL_OK")
</pallas_src>

<mosaic_0001>
module attributes {stable_mosaic.version = 11 : i64} {
  func.func @kernel(%arg0: memref<8x8xf32, #tpu.memory_space<vmem>>, %arg1: memref<8x128xf32, #tpu.memory_space<vmem>>, %arg2: memref<2x32x128xf32, #tpu.memory_space<vmem>>, %arg3: memref<3x32x128xf32, #tpu.memory_space<vmem>>, %arg4: memref<3x1x128xf32, #tpu.memory_space<vmem>>, %arg5: memref<32x128xf32, #tpu.memory_space<vmem>>, %arg6: memref<2x32x128xf32, #tpu.memory_space<vmem>>, %arg7: memref<3x1x128xf32, #tpu.memory_space<vmem>>, %arg8: memref<1x8xf32, #tpu.memory_space<vmem>>) attributes {dimension_semantics = [], scalar_prefetch = 0 : i64, scratch_operands = 0 : i64, tpu.core_type = #tpu.core_type<tc>} {
    %c0 = arith.constant 0 : index
    %c0_0 = arith.constant 0 : index
    %c0_1 = arith.constant 0 : index
    %0 = vector.load %arg3[%c0, %c0_0, %c0_1] : memref<3x32x128xf32, #tpu.memory_space<vmem>>, vector<1x32x128xf32>
    %1 = vector.shape_cast %0 : vector<1x32x128xf32> to vector<32x128xf32>
    %c1 = arith.constant 1 : index
    %c0_2 = arith.constant 0 : index
    %c0_3 = arith.constant 0 : index
    %2 = vector.load %arg3[%c1, %c0_2, %c0_3] : memref<3x32x128xf32, #tpu.memory_space<vmem>>, vector<1x32x128xf32>
    %3 = vector.shape_cast %2 : vector<1x32x128xf32> to vector<32x128xf32>
    %c2 = arith.constant 2 : index
    %c0_4 = arith.constant 0 : index
    %c0_5 = arith.constant 0 : index
    %4 = vector.load %arg3[%c2, %c0_4, %c0_5] : memref<3x32x128xf32, #tpu.memory_space<vmem>>, vector<1x32x128xf32>
    %5 = vector.shape_cast %4 : vector<1x32x128xf32> to vector<32x128xf32>
    %c0_6 = arith.constant 0 : index
    %c0_7 = arith.constant 0 : index
    %c0_8 = arith.constant 0 : index
    %6 = vector.load %arg2[%c0_6, %c0_7, %c0_8] : memref<2x32x128xf32, #tpu.memory_space<vmem>>, vector<1x32x128xf32>
    %7 = vector.shape_cast %6 : vector<1x32x128xf32> to vector<32x128xf32>
    %c1_9 = arith.constant 1 : index
    %c0_10 = arith.constant 0 : index
    %c0_11 = arith.constant 0 : index
    %8 = vector.load %arg2[%c1_9, %c0_10, %c0_11] : memref<2x32x128xf32, #tpu.memory_space<vmem>>, vector<1x32x128xf32>
    %9 = vector.shape_cast %8 : vector<1x32x128xf32> to vector<32x128xf32>
    %c0_12 = arith.constant 0 : index
    %c0_13 = arith.constant 0 : index
    %c0_14 = arith.constant 0 : index
    %10 = vector.load %arg4[%c0_12, %c0_13, %c0_14] : memref<3x1x128xf32, #tpu.memory_space<vmem>>, vector<1x1x128xf32>
    %11 = vector.shape_cast %10 : vector<1x1x128xf32> to vector<1x128xf32>
    %c1_15 = arith.constant 1 : index
    %c0_16 = arith.constant 0 : index
    %c0_17 = arith.constant 0 : index
    %12 = vector.load %arg4[%c1_15, %c0_16, %c0_17] : memref<3x1x128xf32, #tpu.memory_space<vmem>>, vector<1x1x128xf32>
    %13 = vector.shape_cast %12 : vector<1x1x128xf32> to vector<1x128xf32>
    %c2_18 = arith.constant 2 : index
    %c0_19 = arith.constant 0 : index
    %c0_20 = arith.constant 0 : index
    %14 = vector.load %arg4[%c2_18, %c0_19, %c0_20] : memref<3x1x128xf32, #tpu.memory_space<vmem>>, vector<1x1x128xf32>
    %15 = vector.shape_cast %14 : vector<1x1x128xf32> to vector<1x128xf32>
    %c0_21 = arith.constant 0 : index
    %c0_22 = arith.constant 0 : index
    %16 = vector.load %arg0[%c0_21, %c0_22] : memref<8x8xf32, #tpu.memory_space<vmem>>, vector<8x8xf32>
    %c0_23 = arith.constant 0 : index
    %c0_24 = arith.constant 0 : index
    %17 = vector.load %arg1[%c0_23, %c0_24] : memref<8x128xf32, #tpu.memory_space<vmem>>, vector<8x128xf32>
    %cst = arith.constant dense<0.000000e+00> : vector<8x128xf32>
    %18 = tpu.matmul %16, %17, %cst {dimension_numbers = #tpu.dot_dimension_numbers<[1], [0], [0], [1], [0, 0, 1, 1], [], []>} : vector<8x8xf32>, vector<8x128xf32>, vector<8x128xf32> -> vector<8x128xf32>
    %19 = vector.broadcast %11 : vector<1x128xf32> to vector<8x128xf32>
    %20 = arith.addf %18, %19 : vector<8x128xf32>
    %cst_25 = arith.constant 0.000000e+00 : f32
    %21 = vector.broadcast %cst_25 : f32 to vector<1x32xf32>
    %22 = vector.extract_strided_slice %20 {offsets = [0, 0], sizes = [1, 128], strides = [1, 1]} : vector<8x128xf32> to vector<1x128xf32>
    %cst_26 = arith.constant dense<0.000000e+00> : vector<1x128xf32>
    %23 = tpu.matmul %21, %1, %cst_26 {dimension_numbers = #tpu.dot_dimension_numbers<[1], [0], [0], [1], [0, 0, 1, 1], [], []>} : vector<1x32xf32>, vector<32x128xf32>, vector<1x128xf32> -> vector<1x128xf32>
    %24 = arith.addf %22, %23 : vector<1x128xf32>
    %25 = vector.extract_strided_slice %24 {offsets = [0, 0], sizes = [1, 96], strides = [1, 1]} : vector<1x128xf32> to vector<1x96xf32>
    %26 = arith.negf %25 : vector<1x96xf32>
    %27 = math.exp %26 : vector<1x96xf32>
    %cst_27 = arith.constant 1.000000e+00 : f32
    %28 = vector.broadcast %cst_27 : f32 to vector<1x96xf32>
    %29 = arith.addf %28, %27 : vector<1x96xf32>
    %30 = arith.divf %28, %29 : vector<1x96xf32>
    %31 = vector.extract_strided_slice %24 {offsets = [0, 96], sizes = [1, 32], strides = [1, 1]} : vector<1x128xf32> to vector<1x32xf32>
    %32 = math.tanh %31 : vector<1x32xf32>
    %33 = vector.extract_strided_slice %30 {offsets = [0, 0], sizes = [1, 32], strides = [1, 1]} : vector<1x96xf32> to vector<1x32xf32>
    %34 = vector.extract_strided_slice %30 {offsets = [0, 32], sizes = [1, 32], strides = [1, 1]} : vector<1x96xf32> to vector<1x32xf32>
    %35 = vector.extract_strided_slice %30 {offsets = [0, 64], sizes = [1, 32], strides = [1, 1]} : vector<1x96xf32> to vector<1x32xf32>
    %36 = arith.mulf %34, %21 : vector<1x32xf32>
    %37 = arith.mulf %33, %32 : vector<1x32xf32>
    %38 = arith.addf %36, %37 : vector<1x32xf32>
    %39 = math.tanh %38 : vector<1x32xf32>
    %40 = arith.mulf %35, %39 : vector<1x32xf32>
    %41 = vector.extract_strided_slice %20 {offsets = [1, 0], sizes = [1, 128], strides = [1, 1]} : vector<8x128xf32> to vector<1x128xf32>
    %cst_28 = arith.constant dense<0.000000e+00> : vector<1x128xf32>
    %42 = tpu.matmul %40, %1, %cst_28 {dimension_numbers = #tpu.dot_dimension_numbers<[1], [0], [0], [1], [0, 0, 1, 1], [], []>} : vector<1x32xf32>, vector<32x128xf32>, vector<1x128xf32> -> vector<1x128xf32>
    %43 = arith.addf %41, %42 : vector<1x128xf32>
    %44 = vector.extract_strided_slice %43 {offsets = [0, 0], sizes = [1, 96], strides = [1, 1]} : vector<1x128xf32> to vector<1x96xf32>
    %45 = arith.negf %44 : vector<1x96xf32>
    %46 = math.exp %45 : vector<1x96xf32>
    %cst_29 = arith.constant 1.000000e+00 : f32
    %47 = vector.broadcast %cst_29 : f32 to vector<1x96xf32>
    %48 = arith.addf %47, %46 : vector<1x96xf32>
    %49 = arith.divf %47, %48 : vector<1x96xf32>
    %50 = vector.extract_strided_slice %43 {offsets = [0, 96], sizes = [1, 32], strides = [1, 1]} : vector<1x128xf32> to vector<1x32xf32>
    %51 = math.tanh %50 : vector<1x32xf32>
    %52 = vector.extract_strided_slice %49 {offsets = [0, 0], sizes = [1, 32], strides = [1, 1]} : vector<1x96xf32> to vector<1x32xf32>
    %53 = vector.extract_strided_slice %49 {offsets = [0, 32], sizes = [1, 32], strides = [1, 1]} : vector<1x96xf32> to vector<1x32xf32>
    %54 = vector.extract_strided_slice %49 {offsets = [0, 64], sizes = [1, 32], strides = [1, 1]} : vector<1x96xf32> to vector<1x32xf32>
    %55 = arith.mulf %53, %38 : vector<1x32xf32>
    %56 = arith.mulf %52, %51 : vector<1x32xf32>
    %57 = arith.addf %55, %56 : vector<1x32xf32>
    %58 = math.tanh %57 : vector<1x32xf32>
    %59 = arith.mulf %54, %58 : vector<1x32xf32>
    %cst_30 = arith.constant dense<0.000000e+00> : vector<1x128xf32>
    %60 = tpu.matmul %40, %7, %cst_30 {dimension_numbers = #tpu.dot_dimension_numbers<[1], [0], [0], [1], [0, 0, 1, 1], [], []>} : vector<1x32xf32>, vector<32x128xf32>, vector<1x128xf32> -> vector<1x128xf32>
    %cst_31 = arith.constant dense<0.000000e+00> : vector<1x128xf32>
    %61 = tpu.matmul %21, %3, %cst_31 {dimension_numbers = #tpu.dot_dimension_numbers<[1], [0], [0], [1], [0, 0, 1, 1], [], []>} : vector<1x32xf32>, vector<32x128xf32>, vector<1x128xf32> -> vector<1x128xf32>
    %62 = arith.addf %60, %61 : vector<1x128xf32>
    %63 = arith.addf %62, %13 : vector<1x128xf32>
    %64 = vector.extract_strided_slice %63 {offsets = [0, 0], sizes = [1, 96], strides = [1, 1]} : vector<1x128xf32> to vector<1x96xf32>
    %65 = arith.negf %64 : vector<1x96xf32>
    %66 = math.exp %65 : vector<1x96xf32>
    %cst_32 = arith.constant 1.000000e+00 : f32
    %67 = vector.broadcast %cst_32 : f32 to vector<1x96xf32>
    %68 = arith.addf %67, %66 : vector<1x96xf32>
    %69 = arith.divf %67, %68 : vector<1x96xf32>
    %70 = vector.extract_strided_slice %63 {offsets = [0, 96], sizes = [1, 32], strides = [1, 1]} : vector<1x128xf32> to vector<1x32xf32>
    %71 = math.tanh %70 : vector<1x32xf32>
    %72 = vector.extract_strided_slice %69 {offsets = [0, 0], sizes = [1, 32], strides = [1, 1]} : vector<1x96xf32> to vector<1x32xf32>
    %73 = vector.extract_strided_slice %69 {offsets = [0, 32], sizes = [1, 32], strides = [1, 1]} : vector<1x96xf32> to vector<1x32xf32>
    %74 = vector.extract_strided_slice %69 {offsets = [0, 64], sizes = [1, 32], strides = [1, 1]} : vector<1x96xf32> to vector<1x32xf32>
    %75 = arith.mulf %73, %21 : vector<1x32xf32>
    %76 = arith.mulf %72, %71 : vector<1x32xf32>
    %77 = arith.addf %75, %76 : vector<1x32xf32>
    %78 = math.tanh %77 : vector<1x32xf32>
    %79 = arith.mulf %74, %78 : vector<1x32xf32>
    %80 = vector.extract_strided_slice %20 {offsets = [2, 0], sizes = [1, 128], strides = [1, 1]} : vector<8x128xf32> to vector<1x128xf32>
    %cst_33 = arith.constant dense<0.000000e+00> : vector<1x128xf32>
    %81 = tpu.matmul %59, %1, %cst_33 {dimension_numbers = #tpu.dot_dimension_numbers<[1], [0], [0], [1], [0, 0, 1, 1], [], []>} : vector<1x32xf32>, vector<32x128xf32>, vector<1x128xf32> -> vector<1x128xf32>
    %82 = arith.addf %80, %81 : vector<1x128xf32>
    %83 = vector.extract_strided_slice %82 {offsets = [0, 0], sizes = [1, 96], strides = [1, 1]} : vector<1x128xf32> to vector<1x96xf32>
    %84 = arith.negf %83 : vector<1x96xf32>
    %85 = math.exp %84 : vector<1x96xf32>
    %cst_34 = arith.constant 1.000000e+00 : f32
    %86 = vector.broadcast %cst_34 : f32 to vector<1x96xf32>
    %87 = arith.addf %86, %85 : vector<1x96xf32>
    %88 = arith.divf %86, %87 : vector<1x96xf32>
    %89 = vector.extract_strided_slice %82 {offsets = [0, 96], sizes = [1, 32], strides = [1, 1]} : vector<1x128xf32> to vector<1x32xf32>
    %90 = math.tanh %89 : vector<1x32xf32>
    %91 = vector.extract_strided_slice %88 {offsets = [0, 0], sizes = [1, 32], strides = [1, 1]} : vector<1x96xf32> to vector<1x32xf32>
    %92 = vector.extract_strided_slice %88 {offsets = [0, 32], sizes = [1, 32], strides = [1, 1]} : vector<1x96xf32> to vector<1x32xf32>
    %93 = vector.extract_strided_slice %88 {offsets = [0, 64], sizes = [1, 32], strides = [1, 1]} : vector<1x96xf32> to vector<1x32xf32>
    %94 = arith.mulf %92, %57 : vector<1x32xf32>
    %95 = arith.mulf %91, %90 : vector<1x32xf32>
    %96 = arith.addf %94, %95 : vector<1x32xf32>
    %97 = math.tanh %96 : vector<1x32xf32>
    %98 = arith.mulf %93, %97 : vector<1x32xf32>
    %cst_35 = arith.constant dense<0.000000e+00> : vector<1x128xf32>
    %99 = tpu.matmul %59, %7, %cst_35 {dimension_numbers = #tpu.dot_dimension_numbers<[1], [0], [0], [1], [0, 0, 1, 1], [], []>} : vector<1x32xf32>, vector<32x128xf32>, vector<1x128xf32> -> vector<1x128xf32>
    %cst_36 = arith.constant dense<0.000000e+00> : vector<1x128xf32>
    %100 = tpu.matmul %79, %3, %cst_36 {dimension_numbers = #tpu.dot_dimension_numbers<[1], [0], [0], [1], [0, 0, 1, 1], [], []>} : vector<1x32xf32>, vector<32x128xf32>, vector<1x128xf32> -> vector<1x128xf32>
    %101 = arith.addf %99, %100 : vector<1x128xf32>
    %102 = arith.addf %101, %13 : vector<1x128xf32>
    %103 = vector.extract_strided_slice %102 {offsets = [0, 0], sizes = [1, 96], strides = [1, 1]} : vector<1x128xf32> to vector<1x96xf32>
    %104 = arith.negf %103 : vector<1x96xf32>
    %105 = math.exp %104 : vector<1x96xf32>
    %cst_37 = arith.constant 1.000000e+00 : f32
    %106 = vector.broadcast %cst_37 : f32 to vector<1x96xf32>
    %107 = arith.addf %106, %105 : vector<1x96xf32>
    %108 = arith.divf %106, %107 : vector<1x96xf32>
    %109 = vector.extract_strided_slice %102 {offsets = [0, 96], sizes = [1, 32], strides = [1, 1]} : vector<1x128xf32> to vector<1x32xf32>
    %110 = math.tanh %109 : vector<1x32xf32>
    %111 = vector.extract_strided_slice %108 {offsets = [0, 0], sizes = [1, 32], strides = [1, 1]} : vector<1x96xf32> to vector<1x32xf32>
    %112 = vector.extract_strided_slice %108 {offsets = [0, 32], sizes = [1, 32], strides = [1, 1]} : vector<1x96xf32> to vector<1x32xf32>
    %113 = vector.extract_strided_slice %108 {offsets = [0, 64], sizes = [1, 32], strides = [1, 1]} : vector<1x96xf32> to vector<1x32xf32>
    %114 = arith.mulf %112, %77 : vector<1x32xf32>
    %115 = arith.mulf %111, %110 : vector<1x32xf32>
    %116 = arith.addf %114, %115 : vector<1x32xf32>
    %117 = math.tanh %116 : vector<1x32xf32>
    %118 = arith.mulf %113, %117 : vector<1x32xf32>
    %cst_38 = arith.constant dense<0.000000e+00> : vector<1x128xf32>
    %119 = tpu.matmul %79, %9, %cst_38 {dimension_numbers = #tpu.dot_dimension_numbers<[1], [0], [0], [1], [0, 0, 1, 1], [], []>} : vector<1x32xf32>, vector<32x128xf32>, vector<1x128xf32> -> vector<1x128xf32>
    %cst_39 = arith.constant dense<0.000000e+00> : vector<1x128xf32>
    %120 = tpu.matmul %21, %5, %cst_39 {dimension_numbers = #tpu.dot_dimension_numbers<[1], [0], [0], [1], [0, 0, 1, 1], [], []>} : vector<1x32xf32>, vector<32x128xf32>, vector<1x128xf32> -> vector<1x128xf32>
    %121 = arith.addf %119, %120 : vector<1x128xf32>
    %122 = arith.addf %121, %15 : vector<1x128xf32>
    %123 = vector.extract_strided_slice %122 {offsets = [0, 0], sizes = [1, 96], strides = [1, 1]} : vector<1x128xf32> to vector<1x96xf32>
    %124 = arith.negf %123 : vector<1x96xf32>
    %125 = math.exp %124 : vector<1x96xf32>
    %cst_40 = arith.constant 1.000000e+00 : f32
    %126 = vector.broadcast %cst_40 : f32 to vector<1x96xf32>
    %127 = arith.addf %126, %125 : vector<1x96xf32>
    %128 = arith.divf %126, %127 : vector<1x96xf32>
    %129 = vector.extract_strided_slice %122 {offsets = [0, 96], sizes = [1, 32], strides = [1, 1]} : vector<1x128xf32> to vector<1x32xf32>
    %130 = math.tanh %129 : vector<1x32xf32>
    %131 = vector.extract_strided_slice %128 {offsets = [0, 0], sizes = [1, 32], strides = [1, 1]} : vector<1x96xf32> to vector<1x32xf32>
    %132 = vector.extract_strided_slice %128 {offsets = [0, 32], sizes = [1, 32], strides = [1, 1]} : vector<1x96xf32> to vector<1x32xf32>
    %133 = vector.extract_strided_slice %128 {offsets = [0, 64], sizes = [1, 32], strides = [1, 1]} : vector<1x96xf32> to vector<1x32xf32>
    %134 = arith.mulf %132, %21 : vector<1x32xf32>
    %135 = arith.mulf %131, %130 : vector<1x32xf32>
    %136 = arith.addf %134, %135 : vector<1x32xf32>
    %137 = math.tanh %136 : vector<1x32xf32>
    %138 = arith.mulf %133, %137 : vector<1x32xf32>
    %139 = vector.extract_strided_slice %20 {offsets = [3, 0], sizes = [1, 128], strides = [1, 1]} : vector<8x128xf32> to vector<1x128xf32>
    %cst_41 = arith.constant dense<0.000000e+00> : vector<1x128xf32>
    %140 = tpu.matmul %98, %1, %cst_41 {dimension_numbers = #tpu.dot_dimension_numbers<[1], [0], [0], [1], [0, 0, 1, 1], [], []>} : vector<1x32xf32>, vector<32x128xf32>, vector<1x128xf32> -> vector<1x128xf32>
    %141 = arith.addf %139, %140 : vector<1x128xf32>
    %142 = vector.extract_strided_slice %141 {offsets = [0, 0], sizes = [1, 96], strides = [1, 1]} : vector<1x128xf32> to vector<1x96xf32>
    %143 = arith.negf %142 : vector<1x96xf32>
    %144 = math.exp %143 : vector<1x96xf32>
    %cst_42 = arith.constant 1.000000e+00 : f32
    %145 = vector.broadcast %cst_42 : f32 to vector<1x96xf32>
    %146 = arith.addf %145, %144 : vector<1x96xf32>
    %147 = arith.divf %145, %146 : vector<1x96xf32>
    %148 = vector.extract_strided_slice %141 {offsets = [0, 96], sizes = [1, 32], strides = [1, 1]} : vector<1x128xf32> to vector<1x32xf32>
    %149 = math.tanh %148 : vector<1x32xf32>
    %150 = vector.extract_strided_slice %147 {offsets = [0, 0], sizes = [1, 32], strides = [1, 1]} : vector<1x96xf32> to vector<1x32xf32>
    %151 = vector.extract_strided_slice %147 {offsets = [0, 32], sizes = [1, 32], strides = [1, 1]} : vector<1x96xf32> to vector<1x32xf32>
    %152 = vector.extract_strided_slice %147 {offsets = [0, 64], sizes = [1, 32], strides = [1, 1]} : vector<1x96xf32> to vector<1x32xf32>
    %153 = arith.mulf %151, %96 : vector<1x32xf32>
    %154 = arith.mulf %150, %149 : vector<1x32xf32>
    %155 = arith.addf %153, %154 : vector<1x32xf32>
    %156 = math.tanh %155 : vector<1x32xf32>
    %157 = arith.mulf %152, %156 : vector<1x32xf32>
    %cst_43 = arith.constant dense<0.000000e+00> : vector<1x128xf32>
    %158 = tpu.matmul %98, %7, %cst_43 {dimension_numbers = #tpu.dot_dimension_numbers<[1], [0], [0], [1], [0, 0, 1, 1], [], []>} : vector<1x32xf32>, vector<32x128xf32>, vector<1x128xf32> -> vector<1x128xf32>
    %cst_44 = arith.constant dense<0.000000e+00> : vector<1x128xf32>
    %159 = tpu.matmul %118, %3, %cst_44 {dimension_numbers = #tpu.dot_dimension_numbers<[1], [0], [0], [1], [0, 0, 1, 1], [], []>} : vector<1x32xf32>, vector<32x128xf32>, vector<1x128xf32> -> vector<1x128xf32>
    %160 = arith.addf %158, %159 : vector<1x128xf32>
    %161 = arith.addf %160, %13 : vector<1x128xf32>
    %162 = vector.extract_strided_slice %161 {offsets = [0, 0], sizes = [1, 96], strides = [1, 1]} : vector<1x128xf32> to vector<1x96xf32>
    %163 = arith.negf %162 : vector<1x96xf32>
    %164 = math.exp %163 : vector<1x96xf32>
    %cst_45 = arith.constant 1.000000e+00 : f32
    %165 = vector.broadcast %cst_45 : f32 to vector<1x96xf32>
    %166 = arith.addf %165, %164 : vector<1x96xf32>
    %167 = arith.divf %165, %166 : vector<1x96xf32>
    %168 = vector.extract_strided_slice %161 {offsets = [0, 96], sizes = [1, 32], strides = [1, 1]} : vector<1x128xf32> to vector<1x32xf32>
    %169 = math.tanh %168 : vector<1x32xf32>
    %170 = vector.extract_strided_slice %167 {offsets = [0, 0], sizes = [1, 32], strides = [1, 1]} : vector<1x96xf32> to vector<1x32xf32>
    %171 = vector.extract_strided_slice %167 {offsets = [0, 32], sizes = [1, 32], strides = [1, 1]} : vector<1x96xf32> to vector<1x32xf32>
    %172 = vector.extract_strided_slice %167 {offsets = [0, 64], sizes = [1, 32], strides = [1, 1]} : vector<1x96xf32> to vector<1x32xf32>
    %173 = arith.mulf %171, %116 : vector<1x32xf32>
    %174 = arith.mulf %170, %169 : vector<1x32xf32>
    %175 = arith.addf %173, %174 : vector<1x32xf32>
    %176 = math.tanh %175 : vector<1x32xf32>
    %177 = arith.mulf %172, %176 : vector<1x32xf32>
    %cst_46 = arith.constant dense<0.000000e+00> : vector<1x128xf32>
    %178 = tpu.matmul %118, %9, %cst_46 {dimension_numbers = #tpu.dot_dimension_numbers<[1], [0], [0], [1], [0, 0, 1, 1], [], []>} : vector<1x32xf32>, vector<32x128xf32>, vector<1x128xf32> -> vector<1x128xf32>
    %cst_47 = arith.constant dense<0.000000e+00> : vector<1x128xf32>
    %179 = tpu.matmul %138, %5, %cst_47 {dimension_numbers = #tpu.dot_dimension_numbers<[1], [0], [0], [1], [0, 0, 1, 1], [], []>} : vector<1x32xf32>, vector<32x128xf32>, vector<1x128xf32> -> vector<1x128xf32>
    %180 = arith.addf %178, %179 : vector<1x128xf32>
    %181 = arith.addf %180, %15 : vector<1x128xf32>
    %182 = vector.extract_strided_slice %181 {offsets = [0, 0], sizes = [1, 96], strides = [1, 1]} : vector<1x128xf32> to vector<1x96xf32>
    %183 = arith.negf %182 : vector<1x96xf32>
    %184 = math.exp %183 : vector<1x96xf32>
    %cst_48 = arith.constant 1.000000e+00 : f32
    %185 = vector.broadcast %cst_48 : f32 to vector<1x96xf32>
    %186 = arith.addf %185, %184 : vector<1x96xf32>
    %187 = arith.divf %185, %186 : vector<1x96xf32>
    %188 = vector.extract_strided_slice %181 {offsets = [0, 96], sizes = [1, 32], strides = [1, 1]} : vector<1x128xf32> to vector<1x32xf32>
    %189 = math.tanh %188 : vector<1x32xf32>
    %190 = vector.extract_strided_slice %187 {offsets = [0, 0], sizes = [1, 32], strides = [1, 1]} : vector<1x96xf32> to vector<1x32xf32>
    %191 = vector.extract_strided_slice %187 {offsets = [0, 32], sizes = [1, 32], strides = [1, 1]} : vector<1x96xf32> to vector<1x32xf32>
    %192 = vector.extract_strided_slice %187 {offsets = [0, 64], sizes = [1, 32], strides = [1, 1]} : vector<1x96xf32> to vector<1x32xf32>
    %193 = arith.mulf %191, %136 : vector<1x32xf32>
    %194 = arith.mulf %190, %189 : vector<1x32xf32>
    %195 = arith.addf %193, %194 : vector<1x32xf32>
    %196 = math.tanh %195 : vector<1x32xf32>
    %197 = arith.mulf %192, %196 : vector<1x32xf32>
    %198 = vector.extract_strided_slice %20 {offsets = [4, 0], sizes = [1, 128], strides = [1, 1]} : vector<8x128xf32> to vector<1x128xf32>
    %cst_49 = arith.constant dense<0.000000e+00> : vector<1x128xf32>
    %199 = tpu.matmul %157, %1, %cst_49 {dimension_numbers = #tpu.dot_dimension_numbers<[1], [0], [0], [1], [0, 0, 1, 1], [], []>} : vector<1x32xf32>, vector<32x128xf32>, vector<1x128xf32> -> vector<1x128xf32>
    %200 = arith.addf %198, %199 : vector<1x128xf32>
    %201 = vector.extract_strided_slice %200 {offsets = [0, 0], sizes = [1, 96], strides = [1, 1]} : vector<1x128xf32> to vector<1x96xf32>
    %202 = arith.negf %201 : vector<1x96xf32>
    %203 = math.exp %202 : vector<1x96xf32>
    %cst_50 = arith.constant 1.000000e+00 : f32
    %204 = vector.broadcast %cst_50 : f32 to vector<1x96xf32>
    %205 = arith.addf %204, %203 : vector<1x96xf32>
    %206 = arith.divf %204, %205 : vector<1x96xf32>
    %207 = vector.extract_strided_slice %200 {offsets = [0, 96], sizes = [1, 32], strides = [1, 1]} : vector<1x128xf32> to vector<1x32xf32>
    %208 = math.tanh %207 : vector<1x32xf32>
    %209 = vector.extract_strided_slice %206 {offsets = [0, 0], sizes = [1, 32], strides = [1, 1]} : vector<1x96xf32> to vector<1x32xf32>
    %210 = vector.extract_strided_slice %206 {offsets = [0, 32], sizes = [1, 32], strides = [1, 1]} : vector<1x96xf32> to vector<1x32xf32>
    %211 = vector.extract_strided_slice %206 {offsets = [0, 64], sizes = [1, 32], strides = [1, 1]} : vector<1x96xf32> to vector<1x32xf32>
    %212 = arith.mulf %210, %155 : vector<1x32xf32>
    %213 = arith.mulf %209, %208 : vector<1x32xf32>
    %214 = arith.addf %212, %213 : vector<1x32xf32>
    %215 = math.tanh %214 : vector<1x32xf32>
    %216 = arith.mulf %211, %215 : vector<1x32xf32>
    %cst_51 = arith.constant dense<0.000000e+00> : vector<1x128xf32>
    %217 = tpu.matmul %157, %7, %cst_51 {dimension_numbers = #tpu.dot_dimension_numbers<[1], [0], [0], [1], [0, 0, 1, 1], [], []>} : vector<1x32xf32>, vector<32x128xf32>, vector<1x128xf32> -> vector<1x128xf32>
    %cst_52 = arith.constant dense<0.000000e+00> : vector<1x128xf32>
    %218 = tpu.matmul %177, %3, %cst_52 {dimension_numbers = #tpu.dot_dimension_numbers<[1], [0], [0], [1], [0, 0, 1, 1], [], []>} : vector<1x32xf32>, vector<32x128xf32>, vector<1x128xf32> -> vector<1x128xf32>
    %219 = arith.addf %217, %218 : vector<1x128xf32>
    %220 = arith.addf %219, %13 : vector<1x128xf32>
    %221 = vector.extract_strided_slice %220 {offsets = [0, 0], sizes = [1, 96], strides = [1, 1]} : vector<1x128xf32> to vector<1x96xf32>
    %222 = arith.negf %221 : vector<1x96xf32>
    %223 = math.exp %222 : vector<1x96xf32>
    %cst_53 = arith.constant 1.000000e+00 : f32
    %224 = vector.broadcast %cst_53 : f32 to vector<1x96xf32>
    %225 = arith.addf %224, %223 : vector<1x96xf32>
    %226 = arith.divf %224, %225 : vector<1x96xf32>
    %227 = vector.extract_strided_slice %220 {offsets = [0, 96], sizes = [1, 32], strides = [1, 1]} : vector<1x128xf32> to vector<1x32xf32>
    %228 = math.tanh %227 : vector<1x32xf32>
    %229 = vector.extract_strided_slice %226 {offsets = [0, 0], sizes = [1, 32], strides = [1, 1]} : vector<1x96xf32> to vector<1x32xf32>
    %230 = vector.extract_strided_slice %226 {offsets = [0, 32], sizes = [1, 32], strides = [1, 1]} : vector<1x96xf32> to vector<1x32xf32>
    %231 = vector.extract_strided_slice %226 {offsets = [0, 64], sizes = [1, 32], strides = [1, 1]} : vector<1x96xf32> to vector<1x32xf32>
    %232 = arith.mulf %230, %175 : vector<1x32xf32>
    %233 = arith.mulf %229, %228 : vector<1x32xf32>
    %234 = arith.addf %232, %233 : vector<1x32xf32>
    %235 = math.tanh %234 : vector<1x32xf32>
    %236 = arith.mulf %231, %235 : vector<1x32xf32>
    %cst_54 = arith.constant dense<0.000000e+00> : vector<1x128xf32>
    %237 = tpu.matmul %177, %9, %cst_54 {dimension_numbers = #tpu.dot_dimension_numbers<[1], [0], [0], [1], [0, 0, 1, 1], [], []>} : vector<1x32xf32>, vector<32x128xf32>, vector<1x128xf32> -> vector<1x128xf32>
    %cst_55 = arith.constant dense<0.000000e+00> : vector<1x128xf32>
    %238 = tpu.matmul %197, %5, %cst_55 {dimension_numbers = #tpu.dot_dimension_numbers<[1], [0], [0], [1], [0, 0, 1, 1], [], []>} : vector<1x32xf32>, vector<32x128xf32>, vector<1x128xf32> -> vector<1x128xf32>
    %239 = arith.addf %237, %238 : vector<1x128xf32>
    %240 = arith.addf %239, %15 : vector<1x128xf32>
    %241 = vector.extract_strided_slice %240 {offsets = [0, 0], sizes = [1, 96], strides = [1, 1]} : vector<1x128xf32> to vector<1x96xf32>
    %242 = arith.negf %241 : vector<1x96xf32>
    %243 = math.exp %242 : vector<1x96xf32>
    %cst_56 = arith.constant 1.000000e+00 : f32
    %244 = vector.broadcast %cst_56 : f32 to vector<1x96xf32>
    %245 = arith.addf %244, %243 : vector<1x96xf32>
    %246 = arith.divf %244, %245 : vector<1x96xf32>
    %247 = vector.extract_strided_slice %240 {offsets = [0, 96], sizes = [1, 32], strides = [1, 1]} : vector<1x128xf32> to vector<1x32xf32>
    %248 = math.tanh %247 : vector<1x32xf32>
    %249 = vector.extract_strided_slice %246 {offsets = [0, 0], sizes = [1, 32], strides = [1, 1]} : vector<1x96xf32> to vector<1x32xf32>
    %250 = vector.extract_strided_slice %246 {offsets = [0, 32], sizes = [1, 32], strides = [1, 1]} : vector<1x96xf32> to vector<1x32xf32>
    %251 = vector.extract_strided_slice %246 {offsets = [0, 64], sizes = [1, 32], strides = [1, 1]} : vector<1x96xf32> to vector<1x32xf32>
    %252 = arith.mulf %250, %195 : vector<1x32xf32>
    %253 = arith.mulf %249, %248 : vector<1x32xf32>
    %254 = arith.addf %252, %253 : vector<1x32xf32>
    %255 = math.tanh %254 : vector<1x32xf32>
    %256 = arith.mulf %251, %255 : vector<1x32xf32>
    %257 = vector.extract_strided_slice %20 {offsets = [5, 0], sizes = [1, 128], strides = [1, 1]} : vector<8x128xf32> to vector<1x128xf32>
    %cst_57 = arith.constant dense<0.000000e+00> : vector<1x128xf32>
    %258 = tpu.matmul %216, %1, %cst_57 {dimension_numbers = #tpu.dot_dimension_numbers<[1], [0], [0], [1], [0, 0, 1, 1], [], []>} : vector<1x32xf32>, vector<32x128xf32>, vector<1x128xf32> -> vector<1x128xf32>
    %259 = arith.addf %257, %258 : vector<1x128xf32>
    %260 = vector.extract_strided_slice %259 {offsets = [0, 0], sizes = [1, 96], strides = [1, 1]} : vector<1x128xf32> to vector<1x96xf32>
    %261 = arith.negf %260 : vector<1x96xf32>
    %262 = math.exp %261 : vector<1x96xf32>
    %cst_58 = arith.constant 1.000000e+00 : f32
    %263 = vector.broadcast %cst_58 : f32 to vector<1x96xf32>
    %264 = arith.addf %263, %262 : vector<1x96xf32>
    %265 = arith.divf %263, %264 : vector<1x96xf32>
    %266 = vector.extract_strided_slice %259 {offsets = [0, 96], sizes = [1, 32], strides = [1, 1]} : vector<1x128xf32> to vector<1x32xf32>
    %267 = math.tanh %266 : vector<1x32xf32>
    %268 = vector.extract_strided_slice %265 {offsets = [0, 0], sizes = [1, 32], strides = [1, 1]} : vector<1x96xf32> to vector<1x32xf32>
    %269 = vector.extract_strided_slice %265 {offsets = [0, 32], sizes = [1, 32], strides = [1, 1]} : vector<1x96xf32> to vector<1x32xf32>
    %270 = vector.extract_strided_slice %265 {offsets = [0, 64], sizes = [1, 32], strides = [1, 1]} : vector<1x96xf32> to vector<1x32xf32>
    %271 = arith.mulf %269, %214 : vector<1x32xf32>
    %272 = arith.mulf %268, %267 : vector<1x32xf32>
    %273 = arith.addf %271, %272 : vector<1x32xf32>
    %274 = math.tanh %273 : vector<1x32xf32>
    %275 = arith.mulf %270, %274 : vector<1x32xf32>
    %cst_59 = arith.constant dense<0.000000e+00> : vector<1x128xf32>
    %276 = tpu.matmul %216, %7, %cst_59 {dimension_numbers = #tpu.dot_dimension_numbers<[1], [0], [0], [1], [0, 0, 1, 1], [], []>} : vector<1x32xf32>, vector<32x128xf32>, vector<1x128xf32> -> vector<1x128xf32>
    %cst_60 = arith.constant dense<0.000000e+00> : vector<1x128xf32>
    %277 = tpu.matmul %236, %3, %cst_60 {dimension_numbers = #tpu.dot_dimension_numbers<[1], [0], [0], [1], [0, 0, 1, 1], [], []>} : vector<1x32xf32>, vector<32x128xf32>, vector<1x128xf32> -> vector<1x128xf32>
    %278 = arith.addf %276, %277 : vector<1x128xf32>
    %279 = arith.addf %278, %13 : vector<1x128xf32>
    %280 = vector.extract_strided_slice %279 {offsets = [0, 0], sizes = [1, 96], strides = [1, 1]} : vector<1x128xf32> to vector<1x96xf32>
    %281 = arith.negf %280 : vector<1x96xf32>
    %282 = math.exp %281 : vector<1x96xf32>
    %cst_61 = arith.constant 1.000000e+00 : f32
    %283 = vector.broadcast %cst_61 : f32 to vector<1x96xf32>
    %284 = arith.addf %283, %282 : vector<1x96xf32>
    %285 = arith.divf %283, %284 : vector<1x96xf32>
    %286 = vector.extract_strided_slice %279 {offsets = [0, 96], sizes = [1, 32], strides = [1, 1]} : vector<1x128xf32> to vector<1x32xf32>
    %287 = math.tanh %286 : vector<1x32xf32>
    %288 = vector.extract_strided_slice %285 {offsets = [0, 0], sizes = [1, 32], strides = [1, 1]} : vector<1x96xf32> to vector<1x32xf32>
    %289 = vector.extract_strided_slice %285 {offsets = [0, 32], sizes = [1, 32], strides = [1, 1]} : vector<1x96xf32> to vector<1x32xf32>
    %290 = vector.extract_strided_slice %285 {offsets = [0, 64], sizes = [1, 32], strides = [1, 1]} : vector<1x96xf32> to vector<1x32xf32>
    %291 = arith.mulf %289, %234 : vector<1x32xf32>
    %292 = arith.mulf %288, %287 : vector<1x32xf32>
    %293 = arith.addf %291, %292 : vector<1x32xf32>
    %294 = math.tanh %293 : vector<1x32xf32>
    %295 = arith.mulf %290, %294 : vector<1x32xf32>
    %cst_62 = arith.constant dense<0.000000e+00> : vector<1x128xf32>
    %296 = tpu.matmul %236, %9, %cst_62 {dimension_numbers = #tpu.dot_dimension_numbers<[1], [0], [0], [1], [0, 0, 1, 1], [], []>} : vector<1x32xf32>, vector<32x128xf32>, vector<1x128xf32> -> vector<1x128xf32>
    %cst_63 = arith.constant dense<0.000000e+00> : vector<1x128xf32>
    %297 = tpu.matmul %256, %5, %cst_63 {dimension_numbers = #tpu.dot_dimension_numbers<[1], [0], [0], [1], [0, 0, 1, 1], [], []>} : vector<1x32xf32>, vector<32x128xf32>, vector<1x128xf32> -> vector<1x128xf32>
    %298 = arith.addf %296, %297 : vector<1x128xf32>
    %299 = arith.addf %298, %15 : vector<1x128xf32>
    %300 = vector.extract_strided_slice %299 {offsets = [0, 0], sizes = [1, 96], strides = [1, 1]} : vector<1x128xf32> to vector<1x96xf32>
    %301 = arith.negf %300 : vector<1x96xf32>
    %302 = math.exp %301 : vector<1x96xf32>
    %cst_64 = arith.constant 1.000000e+00 : f32
    %303 = vector.broadcast %cst_64 : f32 to vector<1x96xf32>
    %304 = arith.addf %303, %302 : vector<1x96xf32>
    %305 = arith.divf %303, %304 : vector<1x96xf32>
    %306 = vector.extract_strided_slice %299 {offsets = [0, 96], sizes = [1, 32], strides = [1, 1]} : vector<1x128xf32> to vector<1x32xf32>
    %307 = math.tanh %306 : vector<1x32xf32>
    %308 = vector.extract_strided_slice %305 {offsets = [0, 0], sizes = [1, 32], strides = [1, 1]} : vector<1x96xf32> to vector<1x32xf32>
    %309 = vector.extract_strided_slice %305 {offsets = [0, 32], sizes = [1, 32], strides = [1, 1]} : vector<1x96xf32> to vector<1x32xf32>
    %310 = vector.extract_strided_slice %305 {offsets = [0, 64], sizes = [1, 32], strides = [1, 1]} : vector<1x96xf32> to vector<1x32xf32>
    %311 = arith.mulf %309, %254 : vector<1x32xf32>
    %312 = arith.mulf %308, %307 : vector<1x32xf32>
    %313 = arith.addf %311, %312 : vector<1x32xf32>
    %314 = math.tanh %313 : vector<1x32xf32>
    %315 = arith.mulf %310, %314 : vector<1x32xf32>
    %316 = vector.extract_strided_slice %20 {offsets = [6, 0], sizes = [1, 128], strides = [1, 1]} : vector<8x128xf32> to vector<1x128xf32>
    %cst_65 = arith.constant dense<0.000000e+00> : vector<1x128xf32>
    %317 = tpu.matmul %275, %1, %cst_65 {dimension_numbers = #tpu.dot_dimension_numbers<[1], [0], [0], [1], [0, 0, 1, 1], [], []>} : vector<1x32xf32>, vector<32x128xf32>, vector<1x128xf32> -> vector<1x128xf32>
    %318 = arith.addf %316, %317 : vector<1x128xf32>
    %319 = vector.extract_strided_slice %318 {offsets = [0, 0], sizes = [1, 96], strides = [1, 1]} : vector<1x128xf32> to vector<1x96xf32>
    %320 = arith.negf %319 : vector<1x96xf32>
    %321 = math.exp %320 : vector<1x96xf32>
    %cst_66 = arith.constant 1.000000e+00 : f32
    %322 = vector.broadcast %cst_66 : f32 to vector<1x96xf32>
    %323 = arith.addf %322, %321 : vector<1x96xf32>
    %324 = arith.divf %322, %323 : vector<1x96xf32>
    %325 = vector.extract_strided_slice %318 {offsets = [0, 96], sizes = [1, 32], strides = [1, 1]} : vector<1x128xf32> to vector<1x32xf32>
    %326 = math.tanh %325 : vector<1x32xf32>
    %327 = vector.extract_strided_slice %324 {offsets = [0, 0], sizes = [1, 32], strides = [1, 1]} : vector<1x96xf32> to vector<1x32xf32>
    %328 = vector.extract_strided_slice %324 {offsets = [0, 32], sizes = [1, 32], strides = [1, 1]} : vector<1x96xf32> to vector<1x32xf32>
    %329 = vector.extract_strided_slice %324 {offsets = [0, 64], sizes = [1, 32], strides = [1, 1]} : vector<1x96xf32> to vector<1x32xf32>
    %330 = arith.mulf %328, %273 : vector<1x32xf32>
    %331 = arith.mulf %327, %326 : vector<1x32xf32>
    %332 = arith.addf %330, %331 : vector<1x32xf32>
    %333 = math.tanh %332 : vector<1x32xf32>
    %334 = arith.mulf %329, %333 : vector<1x32xf32>
    %cst_67 = arith.constant dense<0.000000e+00> : vector<1x128xf32>
    %335 = tpu.matmul %275, %7, %cst_67 {dimension_numbers = #tpu.dot_dimension_numbers<[1], [0], [0], [1], [0, 0, 1, 1], [], []>} : vector<1x32xf32>, vector<32x128xf32>, vector<1x128xf32> -> vector<1x128xf32>
    %cst_68 = arith.constant dense<0.000000e+00> : vector<1x128xf32>
    %336 = tpu.matmul %295, %3, %cst_68 {dimension_numbers = #tpu.dot_dimension_numbers<[1], [0], [0], [1], [0, 0, 1, 1], [], []>} : vector<1x32xf32>, vector<32x128xf32>, vector<1x128xf32> -> vector<1x128xf32>
    %337 = arith.addf %335, %336 : vector<1x128xf32>
    %338 = arith.addf %337, %13 : vector<1x128xf32>
    %339 = vector.extract_strided_slice %338 {offsets = [0, 0], sizes = [1, 96], strides = [1, 1]} : vector<1x128xf32> to vector<1x96xf32>
    %340 = arith.negf %339 : vector<1x96xf32>
    %341 = math.exp %340 : vector<1x96xf32>
    %cst_69 = arith.constant 1.000000e+00 : f32
    %342 = vector.broadcast %cst_69 : f32 to vector<1x96xf32>
    %343 = arith.addf %342, %341 : vector<1x96xf32>
    %344 = arith.divf %342, %343 : vector<1x96xf32>
    %345 = vector.extract_strided_slice %338 {offsets = [0, 96], sizes = [1, 32], strides = [1, 1]} : vector<1x128xf32> to vector<1x32xf32>
    %346 = math.tanh %345 : vector<1x32xf32>
    %347 = vector.extract_strided_slice %344 {offsets = [0, 0], sizes = [1, 32], strides = [1, 1]} : vector<1x96xf32> to vector<1x32xf32>
    %348 = vector.extract_strided_slice %344 {offsets = [0, 32], sizes = [1, 32], strides = [1, 1]} : vector<1x96xf32> to vector<1x32xf32>
    %349 = vector.extract_strided_slice %344 {offsets = [0, 64], sizes = [1, 32], strides = [1, 1]} : vector<1x96xf32> to vector<1x32xf32>
    %350 = arith.mulf %348, %293 : vector<1x32xf32>
    %351 = arith.mulf %347, %346 : vector<1x32xf32>
    %352 = arith.addf %350, %351 : vector<1x32xf32>
    %353 = math.tanh %352 : vector<1x32xf32>
    %354 = arith.mulf %349, %353 : vector<1x32xf32>
    %cst_70 = arith.constant dense<0.000000e+00> : vector<1x128xf32>
    %355 = tpu.matmul %295, %9, %cst_70 {dimension_numbers = #tpu.dot_dimension_numbers<[1], [0], [0], [1], [0, 0, 1, 1], [], []>} : vector<1x32xf32>, vector<32x128xf32>, vector<1x128xf32> -> vector<1x128xf32>
    %cst_71 = arith.constant dense<0.000000e+00> : vector<1x128xf32>
    %356 = tpu.matmul %315, %5, %cst_71 {dimension_numbers = #tpu.dot_dimension_numbers<[1], [0], [0], [1], [0, 0, 1, 1], [], []>} : vector<1x32xf32>, vector<32x128xf32>, vector<1x128xf32> -> vector<1x128xf32>
    %357 = arith.addf %355, %356 : vector<1x128xf32>
    %358 = arith.addf %357, %15 : vector<1x128xf32>
    %359 = vector.extract_strided_slice %358 {offsets = [0, 0], sizes = [1, 96], strides = [1, 1]} : vector<1x128xf32> to vector<1x96xf32>
    %360 = arith.negf %359 : vector<1x96xf32>
    %361 = math.exp %360 : vector<1x96xf32>
    %cst_72 = arith.constant 1.000000e+00 : f32
    %362 = vector.broadcast %cst_72 : f32 to vector<1x96xf32>
    %363 = arith.addf %362, %361 : vector<1x96xf32>
    %364 = arith.divf %362, %363 : vector<1x96xf32>
    %365 = vector.extract_strided_slice %358 {offsets = [0, 96], sizes = [1, 32], strides = [1, 1]} : vector<1x128xf32> to vector<1x32xf32>
    %366 = math.tanh %365 : vector<1x32xf32>
    %367 = vector.extract_strided_slice %364 {offsets = [0, 0], sizes = [1, 32], strides = [1, 1]} : vector<1x96xf32> to vector<1x32xf32>
    %368 = vector.extract_strided_slice %364 {offsets = [0, 32], sizes = [1, 32], strides = [1, 1]} : vector<1x96xf32> to vector<1x32xf32>
    %369 = vector.extract_strided_slice %364 {offsets = [0, 64], sizes = [1, 32], strides = [1, 1]} : vector<1x96xf32> to vector<1x32xf32>
    %370 = arith.mulf %368, %313 : vector<1x32xf32>
    %371 = arith.mulf %367, %366 : vector<1x32xf32>
    %372 = arith.addf %370, %371 : vector<1x32xf32>
    %373 = math.tanh %372 : vector<1x32xf32>
    %374 = arith.mulf %369, %373 : vector<1x32xf32>
    %375 = vector.extract_strided_slice %20 {offsets = [7, 0], sizes = [1, 128], strides = [1, 1]} : vector<8x128xf32> to vector<1x128xf32>
    %cst_73 = arith.constant dense<0.000000e+00> : vector<1x128xf32>
    %376 = tpu.matmul %334, %1, %cst_73 {dimension_numbers = #tpu.dot_dimension_numbers<[1], [0], [0], [1], [0, 0, 1, 1], [], []>} : vector<1x32xf32>, vector<32x128xf32>, vector<1x128xf32> -> vector<1x128xf32>
    %377 = arith.addf %375, %376 : vector<1x128xf32>
    %378 = vector.extract_strided_slice %377 {offsets = [0, 0], sizes = [1, 96], strides = [1, 1]} : vector<1x128xf32> to vector<1x96xf32>
    %379 = arith.negf %378 : vector<1x96xf32>
    %380 = math.exp %379 : vector<1x96xf32>
    %cst_74 = arith.constant 1.000000e+00 : f32
    %381 = vector.broadcast %cst_74 : f32 to vector<1x96xf32>
    %382 = arith.addf %381, %380 : vector<1x96xf32>
    %383 = arith.divf %381, %382 : vector<1x96xf32>
    %384 = vector.extract_strided_slice %377 {offsets = [0, 96], sizes = [1, 32], strides = [1, 1]} : vector<1x128xf32> to vector<1x32xf32>
    %385 = math.tanh %384 : vector<1x32xf32>
    %386 = vector.extract_strided_slice %383 {offsets = [0, 0], sizes = [1, 32], strides = [1, 1]} : vector<1x96xf32> to vector<1x32xf32>
    %387 = vector.extract_strided_slice %383 {offsets = [0, 32], sizes = [1, 32], strides = [1, 1]} : vector<1x96xf32> to vector<1x32xf32>
    %388 = vector.extract_strided_slice %383 {offsets = [0, 64], sizes = [1, 32], strides = [1, 1]} : vector<1x96xf32> to vector<1x32xf32>
    %389 = arith.mulf %387, %332 : vector<1x32xf32>
    %390 = arith.mulf %386, %385 : vector<1x32xf32>
    %391 = arith.addf %389, %390 : vector<1x32xf32>
    %392 = math.tanh %391 : vector<1x32xf32>
    %393 = arith.mulf %388, %392 : vector<1x32xf32>
    %cst_75 = arith.constant dense<0.000000e+00> : vector<1x128xf32>
    %394 = tpu.matmul %334, %7, %cst_75 {dimension_numbers = #tpu.dot_dimension_numbers<[1], [0], [0], [1], [0, 0, 1, 1], [], []>} : vector<1x32xf32>, vector<32x128xf32>, vector<1x128xf32> -> vector<1x128xf32>
    %cst_76 = arith.constant dense<0.000000e+00> : vector<1x128xf32>
    %395 = tpu.matmul %354, %3, %cst_76 {dimension_numbers = #tpu.dot_dimension_numbers<[1], [0], [0], [1], [0, 0, 1, 1], [], []>} : vector<1x32xf32>, vector<32x128xf32>, vector<1x128xf32> -> vector<1x128xf32>
    %396 = arith.addf %394, %395 : vector<1x128xf32>
    %397 = arith.addf %396, %13 : vector<1x128xf32>
    %398 = vector.extract_strided_slice %397 {offsets = [0, 0], sizes = [1, 96], strides = [1, 1]} : vector<1x128xf32> to vector<1x96xf32>
    %399 = arith.negf %398 : vector<1x96xf32>
    %400 = math.exp %399 : vector<1x96xf32>
    %cst_77 = arith.constant 1.000000e+00 : f32
    %401 = vector.broadcast %cst_77 : f32 to vector<1x96xf32>
    %402 = arith.addf %401, %400 : vector<1x96xf32>
    %403 = arith.divf %401, %402 : vector<1x96xf32>
    %404 = vector.extract_strided_slice %397 {offsets = [0, 96], sizes = [1, 32], strides = [1, 1]} : vector<1x128xf32> to vector<1x32xf32>
    %405 = math.tanh %404 : vector<1x32xf32>
    %406 = vector.extract_strided_slice %403 {offsets = [0, 0], sizes = [1, 32], strides = [1, 1]} : vector<1x96xf32> to vector<1x32xf32>
    %407 = vector.extract_strided_slice %403 {offsets = [0, 32], sizes = [1, 32], strides = [1, 1]} : vector<1x96xf32> to vector<1x32xf32>
    %408 = vector.extract_strided_slice %403 {offsets = [0, 64], sizes = [1, 32], strides = [1, 1]} : vector<1x96xf32> to vector<1x32xf32>
    %409 = arith.mulf %407, %352 : vector<1x32xf32>
    %410 = arith.mulf %406, %405 : vector<1x32xf32>
    %411 = arith.addf %409, %410 : vector<1x32xf32>
    %412 = math.tanh %411 : vector<1x32xf32>
    %413 = arith.mulf %408, %412 : vector<1x32xf32>
    %cst_78 = arith.constant dense<0.000000e+00> : vector<1x128xf32>
    %414 = tpu.matmul %354, %9, %cst_78 {dimension_numbers = #tpu.dot_dimension_numbers<[1], [0], [0], [1], [0, 0, 1, 1], [], []>} : vector<1x32xf32>, vector<32x128xf32>, vector<1x128xf32> -> vector<1x128xf32>
    %cst_79 = arith.constant dense<0.000000e+00> : vector<1x128xf32>
    %415 = tpu.matmul %374, %5, %cst_79 {dimension_numbers = #tpu.dot_dimension_numbers<[1], [0], [0], [1], [0, 0, 1, 1], [], []>} : vector<1x32xf32>, vector<32x128xf32>, vector<1x128xf32> -> vector<1x128xf32>
    %416 = arith.addf %414, %415 : vector<1x128xf32>
    %417 = arith.addf %416, %15 : vector<1x128xf32>
    %418 = vector.extract_strided_slice %417 {offsets = [0, 0], sizes = [1, 96], strides = [1, 1]} : vector<1x128xf32> to vector<1x96xf32>
    %419 = arith.negf %418 : vector<1x96xf32>
    %420 = math.exp %419 : vector<1x96xf32>
    %cst_80 = arith.constant 1.000000e+00 : f32
    %421 = vector.broadcast %cst_80 : f32 to vector<1x96xf32>
    %422 = arith.addf %421, %420 : vector<1x96xf32>
    %423 = arith.divf %421, %422 : vector<1x96xf32>
    %424 = vector.extract_strided_slice %417 {offsets = [0, 96], sizes = [1, 32], strides = [1, 1]} : vector<1x128xf32> to vector<1x32xf32>
    %425 = math.tanh %424 : vector<1x32xf32>
    %426 = vector.extract_strided_slice %423 {offsets = [0, 0], sizes = [1, 32], strides = [1, 1]} : vector<1x96xf32> to vector<1x32xf32>
    %427 = vector.extract_strided_slice %423 {offsets = [0, 32], sizes = [1, 32], strides = [1, 1]} : vector<1x96xf32> to vector<1x32xf32>
    %428 = vector.extract_strided_slice %423 {offsets = [0, 64], sizes = [1, 32], strides = [1, 1]} : vector<1x96xf32> to vector<1x32xf32>
    %429 = arith.mulf %427, %372 : vector<1x32xf32>
    %430 = arith.mulf %426, %425 : vector<1x32xf32>
    %431 = arith.addf %429, %430 : vector<1x32xf32>
    %432 = math.tanh %431 : vector<1x32xf32>
    %433 = arith.mulf %428, %432 : vector<1x32xf32>
    %cst_81 = arith.constant dense<0.000000e+00> : vector<1x128xf32>
    %434 = tpu.matmul %393, %7, %cst_81 {dimension_numbers = #tpu.dot_dimension_numbers<[1], [0], [0], [1], [0, 0, 1, 1], [], []>} : vector<1x32xf32>, vector<32x128xf32>, vector<1x128xf32> -> vector<1x128xf32>
    %cst_82 = arith.constant dense<0.000000e+00> : vector<1x128xf32>
    %435 = tpu.matmul %413, %3, %cst_82 {dimension_numbers = #tpu.dot_dimension_numbers<[1], [0], [0], [1], [0, 0, 1, 1], [], []>} : vector<1x32xf32>, vector<32x128xf32>, vector<1x128xf32> -> vector<1x128xf32>
    %436 = arith.addf %434, %435 : vector<1x128xf32>
    %437 = arith.addf %436, %13 : vector<1x128xf32>
    %438 = vector.extract_strided_slice %437 {offsets = [0, 0], sizes = [1, 96], strides = [1, 1]} : vector<1x128xf32> to vector<1x96xf32>
    %439 = arith.negf %438 : vector<1x96xf32>
    %440 = math.exp %439 : vector<1x96xf32>
    %cst_83 = arith.constant 1.000000e+00 : f32
    %441 = vector.broadcast %cst_83 : f32 to vector<1x96xf32>
    %442 = arith.addf %441, %440 : vector<1x96xf32>
    %443 = arith.divf %441, %442 : vector<1x96xf32>
    %444 = vector.extract_strided_slice %437 {offsets = [0, 96], sizes = [1, 32], strides = [1, 1]} : vector<1x128xf32> to vector<1x32xf32>
    %445 = math.tanh %444 : vector<1x32xf32>
    %446 = vector.extract_strided_slice %443 {offsets = [0, 0], sizes = [1, 32], strides = [1, 1]} : vector<1x96xf32> to vector<1x32xf32>
    %447 = vector.extract_strided_slice %443 {offsets = [0, 32], sizes = [1, 32], strides = [1, 1]} : vector<1x96xf32> to vector<1x32xf32>
    %448 = vector.extract_strided_slice %443 {offsets = [0, 64], sizes = [1, 32], strides = [1, 1]} : vector<1x96xf32> to vector<1x32xf32>
    %449 = arith.mulf %447, %411 : vector<1x32xf32>
    %450 = arith.mulf %446, %445 : vector<1x32xf32>
    %451 = arith.addf %449, %450 : vector<1x32xf32>
    %452 = math.tanh %451 : vector<1x32xf32>
    %453 = arith.mulf %448, %452 : vector<1x32xf32>
    %cst_84 = arith.constant dense<0.000000e+00> : vector<1x128xf32>
    %454 = tpu.matmul %413, %9, %cst_84 {dimension_numbers = #tpu.dot_dimension_numbers<[1], [0], [0], [1], [0, 0, 1, 1], [], []>} : vector<1x32xf32>, vector<32x128xf32>, vector<1x128xf32> -> vector<1x128xf32>
    %cst_85 = arith.constant dense<0.000000e+00> : vector<1x128xf32>
    %455 = tpu.matmul %433, %5, %cst_85 {dimension_numbers = #tpu.dot_dimension_numbers<[1], [0], [0], [1], [0, 0, 1, 1], [], []>} : vector<1x32xf32>, vector<32x128xf32>, vector<1x128xf32> -> vector<1x128xf32>
    %456 = arith.addf %454, %455 : vector<1x128xf32>
    %457 = arith.addf %456, %15 : vector<1x128xf32>
    %458 = vector.extract_strided_slice %457 {offsets = [0, 0], sizes = [1, 96], strides = [1, 1]} : vector<1x128xf32> to vector<1x96xf32>
    %459 = arith.negf %458 : vector<1x96xf32>
    %460 = math.exp %459 : vector<1x96xf32>
    %cst_86 = arith.constant 1.000000e+00 : f32
    %461 = vector.broadcast %cst_86 : f32 to vector<1x96xf32>
    %462 = arith.addf %461, %460 : vector<1x96xf32>
    %463 = arith.divf %461, %462 : vector<1x96xf32>
    %464 = vector.extract_strided_slice %457 {offsets = [0, 96], sizes = [1, 32], strides = [1, 1]} : vector<1x128xf32> to vector<1x32xf32>
    %465 = math.tanh %464 : vector<1x32xf32>
    %466 = vector.extract_strided_slice %463 {offsets = [0, 0], sizes = [1, 32], strides = [1, 1]} : vector<1x96xf32> to vector<1x32xf32>
    %467 = vector.extract_strided_slice %463 {offsets = [0, 32], sizes = [1, 32], strides = [1, 1]} : vector<1x96xf32> to vector<1x32xf32>
    %468 = vector.extract_strided_slice %463 {offsets = [0, 64], sizes = [1, 32], strides = [1, 1]} : vector<1x96xf32> to vector<1x32xf32>
    %469 = arith.mulf %467, %431 : vector<1x32xf32>
    %470 = arith.mulf %466, %465 : vector<1x32xf32>
    %471 = arith.addf %469, %470 : vector<1x32xf32>
    %472 = math.tanh %471 : vector<1x32xf32>
    %473 = arith.mulf %468, %472 : vector<1x32xf32>
    %cst_87 = arith.constant dense<0.000000e+00> : vector<1x128xf32>
    %474 = tpu.matmul %453, %9, %cst_87 {dimension_numbers = #tpu.dot_dimension_numbers<[1], [0], [0], [1], [0, 0, 1, 1], [], []>} : vector<1x32xf32>, vector<32x128xf32>, vector<1x128xf32> -> vector<1x128xf32>
    %cst_88 = arith.constant dense<0.000000e+00> : vector<1x128xf32>
    %475 = tpu.matmul %473, %5, %cst_88 {dimension_numbers = #tpu.dot_dimension_numbers<[1], [0], [0], [1], [0, 0, 1, 1], [], []>} : vector<1x32xf32>, vector<32x128xf32>, vector<1x128xf32> -> vector<1x128xf32>
    %476 = arith.addf %474, %475 : vector<1x128xf32>
    %477 = arith.addf %476, %15 : vector<1x128xf32>
    %478 = vector.extract_strided_slice %477 {offsets = [0, 0], sizes = [1, 96], strides = [1, 1]} : vector<1x128xf32> to vector<1x96xf32>
    %479 = arith.negf %478 : vector<1x96xf32>
    %480 = math.exp %479 : vector<1x96xf32>
    %cst_89 = arith.constant 1.000000e+00 : f32
    %481 = vector.broadcast %cst_89 : f32 to vector<1x96xf32>
    %482 = arith.addf %481, %480 : vector<1x96xf32>
    %483 = arith.divf %481, %482 : vector<1x96xf32>
    %484 = vector.extract_strided_slice %477 {offsets = [0, 96], sizes = [1, 32], strides = [1, 1]} : vector<1x128xf32> to vector<1x32xf32>
    %485 = math.tanh %484 : vector<1x32xf32>
    %486 = vector.extract_strided_slice %483 {offsets = [0, 0], sizes = [1, 32], strides = [1, 1]} : vector<1x96xf32> to vector<1x32xf32>
    %487 = vector.extract_strided_slice %483 {offsets = [0, 32], sizes = [1, 32], strides = [1, 1]} : vector<1x96xf32> to vector<1x32xf32>
    %488 = vector.extract_strided_slice %483 {offsets = [0, 64], sizes = [1, 32], strides = [1, 1]} : vector<1x96xf32> to vector<1x32xf32>
    %489 = arith.mulf %487, %471 : vector<1x32xf32>
    %490 = arith.mulf %486, %485 : vector<1x32xf32>
    %491 = arith.addf %489, %490 : vector<1x32xf32>
    %492 = math.tanh %491 : vector<1x32xf32>
    %493 = arith.mulf %488, %492 : vector<1x32xf32>
    %c0_90 = arith.constant 0 : index
    %c0_91 = arith.constant 0 : index
    %494 = vector.load %arg5[%c0_90, %c0_91] : memref<32x128xf32, #tpu.memory_space<vmem>>, vector<32x128xf32>
    %cst_92 = arith.constant dense<0.000000e+00> : vector<1x128xf32>
    %495 = tpu.matmul %493, %494, %cst_92 {dimension_numbers = #tpu.dot_dimension_numbers<[1], [0], [0], [1], [0, 0, 1, 1], [], []>} : vector<1x32xf32>, vector<32x128xf32>, vector<1x128xf32> -> vector<1x128xf32>
    %c0_93 = arith.constant 0 : index
    %c0_94 = arith.constant 0 : index
    %c0_95 = arith.constant 0 : index
    %496 = vector.load %arg7[%c0_93, %c0_94, %c0_95] : memref<3x1x128xf32, #tpu.memory_space<vmem>>, vector<1x1x128xf32>
    %497 = vector.shape_cast %496 : vector<1x1x128xf32> to vector<1x128xf32>
    %498 = arith.addf %495, %497 : vector<1x128xf32>
    %499 = vector.extract_strided_slice %498 {offsets = [0, 0], sizes = [1, 96], strides = [1, 1]} : vector<1x128xf32> to vector<1x96xf32>
    %500 = arith.negf %499 : vector<1x96xf32>
    %501 = math.exp %500 : vector<1x96xf32>
    %cst_96 = arith.constant 1.000000e+00 : f32
    %502 = vector.broadcast %cst_96 : f32 to vector<1x96xf32>
    %503 = arith.addf %502, %501 : vector<1x96xf32>
    %504 = arith.divf %502, %503 : vector<1x96xf32>
    %505 = vector.extract_strided_slice %498 {offsets = [0, 96], sizes = [1, 32], strides = [1, 1]} : vector<1x128xf32> to vector<1x32xf32>
    %506 = math.tanh %505 : vector<1x32xf32>
    %507 = vector.extract_strided_slice %504 {offsets = [0, 0], sizes = [1, 32], strides = [1, 1]} : vector<1x96xf32> to vector<1x32xf32>
    %508 = vector.extract_strided_slice %504 {offsets = [0, 64], sizes = [1, 32], strides = [1, 1]} : vector<1x96xf32> to vector<1x32xf32>
    %509 = arith.mulf %507, %506 : vector<1x32xf32>
    %510 = math.tanh %509 : vector<1x32xf32>
    %511 = arith.mulf %508, %510 : vector<1x32xf32>
    %c0_97 = arith.constant 0 : index
    %c0_98 = arith.constant 0 : index
    %c0_99 = arith.constant 0 : index
    %512 = vector.load %arg6[%c0_97, %c0_98, %c0_99] : memref<2x32x128xf32, #tpu.memory_space<vmem>>, vector<1x32x128xf32>
    %513 = vector.shape_cast %512 : vector<1x32x128xf32> to vector<32x128xf32>
    %cst_100 = arith.constant dense<0.000000e+00> : vector<1x128xf32>
    %514 = tpu.matmul %511, %513, %cst_100 {dimension_numbers = #tpu.dot_dimension_numbers<[1], [0], [0], [1], [0, 0, 1, 1], [], []>} : vector<1x32xf32>, vector<32x128xf32>, vector<1x128xf32> -> vector<1x128xf32>
    %c1_101 = arith.constant 1 : index
    %c0_102 = arith.constant 0 : index
    %c0_103 = arith.constant 0 : index
    %515 = vector.load %arg7[%c1_101, %c0_102, %c0_103] : memref<3x1x128xf32, #tpu.memory_space<vmem>>, vector<1x1x128xf32>
    %516 = vector.shape_cast %515 : vector<1x1x128xf32> to vector<1x128xf32>
    %517 = arith.addf %514, %516 : vector<1x128xf32>
    %518 = vector.extract_strided_slice %517 {offsets = [0, 0], sizes = [1, 96], strides = [1, 1]} : vector<1x128xf32> to vector<1x96xf32>
    %519 = arith.negf %518 : vector<1x96xf32>
    %520 = math.exp %519 : vector<1x96xf32>
    %cst_104 = arith.constant 1.000000e+00 : f32
    %521 = vector.broadcast %cst_104 : f32 to vector<1x96xf32>
    %522 = arith.addf %521, %520 : vector<1x96xf32>
    %523 = arith.divf %521, %522 : vector<1x96xf32>
    %524 = vector.extract_strided_slice %517 {offsets = [0, 96], sizes = [1, 32], strides = [1, 1]} : vector<1x128xf32> to vector<1x32xf32>
    %525 = math.tanh %524 : vector<1x32xf32>
    %526 = vector.extract_strided_slice %523 {offsets = [0, 0], sizes = [1, 32], strides = [1, 1]} : vector<1x96xf32> to vector<1x32xf32>
    %527 = vector.extract_strided_slice %523 {offsets = [0, 64], sizes = [1, 32], strides = [1, 1]} : vector<1x96xf32> to vector<1x32xf32>
    %528 = arith.mulf %526, %525 : vector<1x32xf32>
    %529 = math.tanh %528 : vector<1x32xf32>
    %530 = arith.mulf %527, %529 : vector<1x32xf32>
    %c1_105 = arith.constant 1 : index
    %c0_106 = arith.constant 0 : index
    %c0_107 = arith.constant 0 : index
    %531 = vector.load %arg6[%c1_105, %c0_106, %c0_107] : memref<2x32x128xf32, #tpu.memory_space<vmem>>, vector<1x32x128xf32>
    %532 = vector.shape_cast %531 : vector<1x32x128xf32> to vector<32x128xf32>
    %cst_108 = arith.constant dense<0.000000e+00> : vector<1x128xf32>
    %533 = tpu.matmul %530, %532, %cst_108 {dimension_numbers = #tpu.dot_dimension_numbers<[1], [0], [0], [1], [0, 0, 1, 1], [], []>} : vector<1x32xf32>, vector<32x128xf32>, vector<1x128xf32> -> vector<1x128xf32>
    %c2_109 = arith.constant 2 : index
    %c0_110 = arith.constant 0 : index
    %c0_111 = arith.constant 0 : index
    %534 = vector.load %arg7[%c2_109, %c0_110, %c0_111] : memref<3x1x128xf32, #tpu.memory_space<vmem>>, vector<1x1x128xf32>
    %535 = vector.shape_cast %534 : vector<1x1x128xf32> to vector<1x128xf32>
    %536 = arith.addf %533, %535 : vector<1x128xf32>
    %537 = vector.extract_strided_slice %536 {offsets = [0, 0], sizes = [1, 96], strides = [1, 1]} : vector<1x128xf32> to vector<1x96xf32>
    %538 = arith.negf %537 : vector<1x96xf32>
    %539 = math.exp %538 : vector<1x96xf32>
    %cst_112 = arith.constant 1.000000e+00 : f32
    %540 = vector.broadcast %cst_112 : f32 to vector<1x96xf32>
    %541 = arith.addf %540, %539 : vector<1x96xf32>
    %542 = arith.divf %540, %541 : vector<1x96xf32>
    %543 = vector.extract_strided_slice %536 {offsets = [0, 96], sizes = [1, 32], strides = [1, 1]} : vector<1x128xf32> to vector<1x32xf32>
    %544 = math.tanh %543 : vector<1x32xf32>
    %545 = vector.extract_strided_slice %542 {offsets = [0, 0], sizes = [1, 32], strides = [1, 1]} : vector<1x96xf32> to vector<1x32xf32>
    %546 = vector.extract_strided_slice %542 {offsets = [0, 64], sizes = [1, 32], strides = [1, 1]} : vector<1x96xf32> to vector<1x32xf32>
    %547 = arith.mulf %545, %544 : vector<1x32xf32>
    %548 = math.tanh %547 : vector<1x32xf32>
    %549 = arith.mulf %546, %548 : vector<1x32xf32>
    %550 = vector.extract_strided_slice %549 {offsets = [0, 0], sizes = [1, 8], strides = [1, 1]} : vector<1x32xf32> to vector<1x8xf32>
    %c0_113 = arith.constant 0 : index
    %c0_114 = arith.constant 0 : index
    %551 = vector.load %arg8[%c0_113, %c0_114] : memref<1x8xf32, #tpu.memory_space<vmem>>, vector<1x8xf32>
    tpu.vector_store %arg8[%c0_113, %c0_114], %550 {strides = array<i32>} : memref<1x8xf32, #tpu.memory_space<vmem>>, vector<1x8xf32>,
    return
  }
}

</mosaic_0001>

<bundles_post_ra>
// kernel: lstm_autoencoder_forward.1
= control target key start
LH: loop header
LB: loop body
LE: loop exit
PB: predicated region body
PF: predicated region fallthrough
CT: control target
= control target key end

     0   :  { %13 = vsyncpa [#allocation3], 0  ;;  %s6197_s0 = inlined_call_operand.hbm [shape: f32[8,8], index: 0, kind: input, shape index: {}]   ;;  %s6198_s1 = inlined_call_operand.vmem [shape: f32[8,128], index: 1, kind: input, shape index: {}]   ;;  %s6199_s2 = inlined_call_operand.hbm [shape: f32[2,32,128], index: 2, kind: input, shape index: {}]   ;;  %s6200_s3 = inlined_call_operand.hbm [shape: f32[3,32,128], index: 3, kind: input, shape index: {}]   ;;  %s6201_s4 = inlined_call_operand.vmem [shape: f32[3,1,128], index: 4, kind: input, shape index: {}]   ;;  %s6202_s5 = inlined_call_operand.hbm [shape: f32[32,128], index: 5, kind: input, shape index: {}]   ;;  %s6203_s6 = inlined_call_operand.hbm [shape: f32[2,32,128], index: 6, kind: input, shape index: {}]   ;;  %s6204_s7 = inlined_call_operand.vmem [shape: f32[3,1,128], index: 7, kind: input, shape index: {}]   ;;  %s6205_s8 = inlined_call_operand.hbm [shape: f32[1,8], index: 8, kind: output, shape index: {}]  }
   0x1   :  { %14 = vsyncpa [#allocation6], 0 }
   0x2   :  { %15 = vsyncpa [#allocation9], 0 }
   0x3   :  { %16 = vsyncpa [#allocation4], 0  ;;  %s5491_s27 = smov [#allocation5]   ;;  %s5351_s9 = scalar_lea.hbm %s6199_s2, 1024 }
   0x4   :  { %s34_s28 = sshll.u32 %s5491_s27, 4  ;;  %p5352_p0 = scmp.ne.s32.totalorder %s6199_s2, %s5351_s9  ;;  %s35_s28 = int_to_ptr.vmem [resolvable:$true] %s34_s28 }
   0x5   :  { %p5355_p1 = scmp.lt.u32.totalorder %s5351_s9, %s6199_s2 }
   0x7   :  { %p5357_p2 = pnand %p5355_p1, %p5352_p0 }
   0x9   :  { %5360 = shalt.err (!%p5357_p2)
}
   0xa   :  { %s5361_s14 = scalar_lea.vmem %s35_s28, 1024  ;;  %p5366_p4 = scmp.lt.s32.totalorder %s35_s28, %s35_s28 }
   0xb   :  { %p5362_p3 = scmp.ne.s32.totalorder %s35_s28, %s5361_s14  ;;  %p5367_p5 = scmp.lt.s32.totalorder %s5361_s14, %s5361_s14 }
   0xd   :  { %p5368_p6 = por %p5367_p5, %p5366_p4 }
   0xf   :  { %p5369_p7 = pnand %p5368_p6, %p5362_p3 }
  0x11   :  { %5372 = shalt.err (!%p5369_p7)
}
  0x12   :  { %s5492_s15 = smov 128   ;;  %s5493_s16 = smov 8  }
  0x13   :  { %40 = dma.hbm_to_vmem [thread:$0]  %s6199_s2, 1024, %s35_s28, [#allocation6], %s5492_s15, %s5492_s15, %s5493_s16  }
  0x14   :  { %s5494_s19 = smov [#allocation8]   ;;  %s5495_s21 = smov [#allocation2]  }
  0x15   :  { %s60_s20 = sshll.u32 %s5494_s19, 4  ;;  %s23_s22 = sshll.u32 %s5495_s21, 4  ;;  %s61_s20 = int_to_ptr.vmem [resolvable:$true] %s60_s20  ;;  %s24_s22 = int_to_ptr.vmem [resolvable:$true] %s23_s22 }
  0x16   :  { %s5373_s25 = scalar_lea.hbm %s6202_s5, 512 }
  0x17   :  { %p5374_p8 = scmp.ne.s32.totalorder %s6202_s5, %s5373_s25  ;;  %p5377_p9 = scmp.lt.u32.totalorder %s5373_s25, %s6202_s5 }
  0x19   :  { %p5379_p10 = pnand %p5377_p9, %p5374_p8 }
  0x1b   :  { %5382 = shalt.err (!%p5379_p10)
}
  0x1c   :  { %s5383_s2 = scalar_lea.vmem %s61_s20, 512  ;;  %p5388_p12 = scmp.lt.s32.totalorder %s61_s20, %s61_s20 }
  0x1d   :  { %p5384_p11 = scmp.ne.s32.totalorder %s61_s20, %s5383_s2  ;;  %p5389_p13 = scmp.lt.s32.totalorder %s5383_s2, %s5383_s2 }
  0x1f   :  { %p5390_p0 = por %p5389_p13, %p5388_p12 }
  0x21   :  { %p5391_p1 = pnand %p5390_p0, %p5384_p11 }
  0x23   :  { %5394 = shalt.err (!%p5391_p1)
}
  0x24   :  { %66 = dma.hbm_to_vmem [thread:$0]  %s6202_s5, 512, %s61_s20, [#allocation9], %s5492_s15, %s5492_s15, %s5493_s16  }
  0x25   :  { %s5395_s12 = scalar_lea.hbm %s6197_s0, 128 }
  0x26   :  { %p5396_p2 = scmp.ne.s32.totalorder %s6197_s0, %s5395_s12  ;;  %p5399_p3 = scmp.lt.u32.totalorder %s5395_s12, %s6197_s0 }
  0x28   :  { %p5401_p4 = pnand %p5399_p3, %p5396_p2 }
  0x2a   :  { %5404 = shalt.err (!%p5401_p4)
}
  0x2b   :  { %s5405_s19 = scalar_lea.vmem %s24_s22, 128  ;;  %p5410_p6 = scmp.lt.s32.totalorder %s24_s22, %s24_s22 }
  0x2c   :  { %p5406_p5 = scmp.ne.s32.totalorder %s24_s22, %s5405_s19  ;;  %p5411_p7 = scmp.lt.s32.totalorder %s5405_s19, %s5405_s19 }
  0x2e   :  { %p5412_p8 = por %p5411_p7, %p5410_p6 }
  0x30   :  { %p5413_p9 = pnand %p5412_p8, %p5406_p5 }
  0x32   :  { %5416 = shalt.err (!%p5413_p9)
}
  0x33   :  { %26 = dma.hbm_to_vmem [thread:$0]  %s6197_s0, 128, %s24_s22, [#allocation3]  }
  0x34   :  { %s5496_s21 = smov [#allocation7]   ;;  %s5497_s24 = smov [#allocation10]  }
  0x35   :  { %s46_s23 = sshll.u32 %s5496_s21, 4  ;;  %s72_s25 = sshll.u32 %s5497_s24, 4  ;;  %s47_s23 = int_to_ptr.vmem [resolvable:$true] %s46_s23  ;;  %s73_s25 = int_to_ptr.vmem [resolvable:$true] %s72_s25 }
  0x36   :  { %s5417_s29 = scalar_lea.hbm %s6200_s3, 1536 }
  0x37   :  { %p5418_p10 = scmp.ne.s32.totalorder %s6200_s3, %s5417_s29  ;;  %p5421_p11 = scmp.lt.u32.totalorder %s5417_s29, %s6200_s3 }
  0x39   :  { %p5423_p12 = pnand %p5421_p11, %p5418_p10 }
  0x3b   :  { %5426 = shalt.err (!%p5423_p12)
}
  0x3c   :  { %s5427_s0 = scalar_lea.vmem %s47_s23, 1536  ;;  %p5432_p0 = scmp.lt.s32.totalorder %s47_s23, %s47_s23 }
  0x3d   :  { %p5428_p13 = scmp.ne.s32.totalorder %s47_s23, %s5427_s0  ;;  %p5433_p1 = scmp.lt.s32.totalorder %s5427_s0, %s5427_s0 }
  0x3f   :  { %p5434_p2 = por %p5433_p1, %p5432_p0 }
  0x41   :  { %p5435_p3 = pnand %p5434_p2, %p5428_p13 }
  0x43   :  { %5438 = shalt.err (!%p5435_p3)
}
  0x44   :  { %52 = dma.hbm_to_vmem [thread:$0]  %s6200_s3, 1536, %s47_s23, [#allocation6], %s5492_s15, %s5492_s15, %s5493_s16  }
  0x45   :  { %s5439_s13 = scalar_lea.hbm %s6203_s6, 1024 }
  0x46   :  { %p5440_p4 = scmp.ne.s32.totalorder %s6203_s6, %s5439_s13  ;;  %p5443_p5 = scmp.lt.u32.totalorder %s5439_s13, %s6203_s6 }
  0x48   :  { %p5445_p6 = pnand %p5443_p5, %p5440_p4 }
  0x4a   :  { %5448 = shalt.err (!%p5445_p6)
}
  0x4b   :  { %s5449_s5 = scalar_lea.vmem %s73_s25, 1024  ;;  %p5454_p8 = scmp.lt.s32.totalorder %s73_s25, %s73_s25 }
  0x4c   :  { %p5450_p7 = scmp.ne.s32.totalorder %s73_s25, %s5449_s5  ;;  %p5455_p9 = scmp.lt.s32.totalorder %s5449_s5, %s5449_s5 }
  0x4e   :  { %p5456_p10 = por %p5455_p9, %p5454_p8 }
  0x50   :  { %p5457_p11 = pnand %p5456_p10, %p5450_p7 }
  0x52   :  { %5460 = shalt.err (!%p5457_p11)
}
  0x53   :  { %78 = dma.hbm_to_vmem [thread:$0]  %s6203_s6, 1024, %s73_s25, [#allocation9], %s5492_s15, %s5492_s15, %s5493_s16  }
  0x54   :  { %5483 = dma.done.wait [#allocation3], 128  }
  0x55   :  { %5484 = vsyncadd [#allocation3], 4294967168 }
  0x56   :  { %5485 = dma.done.wait [#allocation6], 2560  }
  0x57   :  { %5486 = vsyncadd [#allocation6], 4294964736 }
  0x58   :  { %5487 = dma.done.wait [#allocation9], 1536  }
  0x59   :  { %5488 = vsyncadd [#allocation9], 4294965760  ;;  %v5498_v0 = vmov 0.0|0.0   ;;  %v5499_v1 = vmov 0.0   ;;  %vm5500_vm0 = vmmov 0   ;;  %vm132_vm1 = vcmask 64512  }
  0x5a   :  { %4862 = vmatprep.subr.bf16.mxu1 %v5498_v0  ;;  %4384 = vmatprep.subr.mxu0 %v5499_v1  ;;  %v96_v2 = vld [vmem:[#allocation7] sm:$0xff]  ;;  %v97_v3 = vld [vmem:[#allocation7 + $0x8] sm:$0xff]  ;;  %v125_v4 = vld [vmem:[%s6198_s1] sm:$0xff]  ;;  %s5501_s21 = smov 32   ;;  %s5502_s23 = smov 64   ;;  %vm206_vm2 = vcmask 261120  }
  0x5b   :  { %4386 = vmatprep.mubr.msk.f32.mxu0 %vm5500_vm0, %v5499_v1  ;;  %4397 = vmatprep.mubr.msk.f32.mxu1 %vm5500_vm0, %v5499_v1  ;;  %v5630_v5 = vpack.c.bf16 %v97_v3, %v96_v2  ;;  %v124_v6 = vld [vmem:[#allocation2] sm:$0xff]  ;;  %v98_v7 = vld [vmem:[#allocation7 + $0x10] sm:$0xff]  ;;  %v101_v28 = vld [vmem:[#allocation7 + $0x20] sm:$0xff]  ;;  %vm4075_vm3 = vcmask 57344  }
  0x5c   :  { %4385 = vmatpush3.msra.mxu0 %v125_v4  ;;  %v99_v8 = vld [vmem:[#allocation7 + $0x18] sm:$0xff]  ;;  %v102_v29 = vld [vmem:[#allocation7 + $0x28] sm:$0xff]  ;;  %v103_v31 = vld [vmem:[#allocation7 + $0x30] sm:$0xff] }
  0x5d   :  { %4387 = vmatmul.mubr.msk.f32.vlgmr.msra.gmra.mrb[0].mxu0 %vm132_vm1, %v124_v6  ;;  %4868 = vmatprep.subr.bf16.mxu0 %v5498_v0  ;;  %v5634_v9 = vpack.c.bf16 %v99_v8, %v98_v7  ;;  %v4096_v12 = vld [vmem:[%s6201_s4] ss:$0 sm:$0xff]  ;;  %v5660_v30 = vpack.c.bf16 %v102_v29, %v101_v28  ;;  %v110_v36 = vld [vmem:[#allocation5] sm:$0xff]  ;;  %v111_v37 = vld [vmem:[#allocation5 + $0x8] sm:$0xff] }
  0x5e   :  { %4864 = vmatpush3.bf16.msra.mxu1 %v5630_v5  ;;  %4870 = vmatpush3.bf16.msra.mxu0 %v5630_v5  ;;  %v104_v32 = vld [vmem:[#allocation7 + $0x38] sm:$0xff]  ;;  %v5676_v38 = vpack.c.bf16 %v111_v37, %v110_v36  ;;  %v112_v39 = vld [vmem:[#allocation5 + $0x10] sm:$0xff] }
  0x5f   :  { %4865 = vmatprep.subr.bf16.mxu1 %v5498_v0  ;;  %4871 = vmatprep.subr.bf16.mxu0 %v5498_v0  ;;  %v5664_v33 = vpack.c.bf16 %v104_v32, %v103_v31  ;;  %v113_v40 = vld [vmem:[#allocation5 + $0x18] sm:$0xff]  ;;  %v108_v29 = vld [vmem:[#allocation7 + $0x50] sm:$0xff] }
  0x60   :  { %4408 = vmatprep.mubr.msk.f32.mxu0 %vm5500_vm0, %v5499_v1  ;;  %v5680_v42 = vpack.c.bf16 %v113_v40, %v112_v39  ;;  %v5698_v49 = vld [vmem:[%s6201_s4 + $0x1] sm:$0x1] }
  0x61   :  { %v109_v31 = vld [vmem:[#allocation7 + $0x58] sm:$0xff] }
  0x62   :  { %4867 = vmatpush3.bf16.msra.mxu1 %v5634_v9  ;;  %4873 = vmatpush3.bf16.msra.mxu0 %v5634_v9  ;;  %v118_v36 = vld [vmem:[#allocation5 + $0x38] sm:$0xff]  ;;  %v5729_v37 = vpack.c.bf16 %v109_v31, %v108_v29 }
  0x63   :  { %4874 = vmatprep.subr.bf16.mxu1 %v5498_v0  ;;  %4880 = vmatprep.subr.bf16.mxu0 %v5498_v0 }
  0x65   :  { %4398 = vmatmul.mubr.f32.vlgmr.msra.gmra.mrb[0].mxu1 %v5499_v1 }
  0x66   :  { %4419 = vmatprep.mubr.msk.f32.mxu1 %vm5500_vm0, %v5499_v1  ;;  %4876 = vmatpush3.bf16.msra.mxu1 %v5660_v30 }
  0x67   :  { %4877 = vmatprep.subr.bf16.mxu1 %v5498_v0 }
  0x6a   :  { %4879 = vmatpush3.bf16.msra.mxu1 %v5664_v33 }
  0x6b   :  { %4886 = vmatprep.subr.bf16.mxu1 %v5498_v0 }
  0x6d   :  { %4420 = vmatmul.mubr.f32.vlgmr.msra.gmra.mrb[2].mxu1 %v5499_v1 }
  0x6e   :  { %4888 = vmatpush3.bf16.msra.mxu1 %v5630_v5  ;;  %4441 = vmatprep.mubr.msk.f32.mxu1 %vm5500_vm0, %v5499_v1 }
  0x6f   :  { %4889 = vmatprep.subr.bf16.mxu1 %v5498_v0 }
  0x72   :  { %4891 = vmatpush3.bf16.msra.mxu1 %v5634_v9 }
  0x73   :  { %4898 = vmatprep.subr.bf16.mxu1 %v5498_v0 }
 0x130   :  { %v202_v10 = vpop.f32.mrb[0].mxu0 }
 0x131   :  { %v4388_v11 = vpop.f32.mrb[1].mxu0  ;;  %v5651_v13 = vadd.f32 %v4096_v12, %v202_v10 }
 0x138   :  { %v276_v14 = vpop.f32.mrb[0].mxu1 }
 0x139   :  { %v280_v15 = vadd.f32 %v276_v14, %v5651_v13  ;;  %v4399_v16 = vpop.f32.mrb[1].mxu1 }
 0x13b   :  { %5133 = vtanh.f32 %v280_v15  ;;  %v4098_v18 = vmul.f32 -1.442695, %v280_v15 }
 0x13d   :  { %5135 = vpow2.f32 %v4098_v18 }
 0x140   :  { %v477_v43 = vpop.f32.mrb[2].mxu1 }
 0x141   :  { %v4421_v44 = vpop.f32.mrb[3].mxu1 }
 0x145   :  { %v5134_v17 = vpop.eup %5133 }
 0x146   :  { %290 = vrot.lane.b32.xlu0 %v5134_v17, %s5501_s21 }
 0x147   :  { %v5136_v19 = vpop.eup %5135 }
 0x148   :  { %v284_v20 = vadd.f32 1.0, %v5136_v19 }
 0x14a   :  { %5137 = vrcp.f32 %v284_v20 }
 0x154   :  { %v5138_v21 = vpop.eup %5137 }
 0x155   :  { %v288_v24 = vmul.f32 0.0, %v5138_v21 }
 0x1b8   :  { %v291_v22 = vpop.permute.xlu0 %290 }
 0x1b9   :  { %v293_v23 = vmul.f32 %v5138_v21, %v291_v22 }
 0x1bb   :  { %295 = vrot.lane.b32.xlu0 %v293_v23, %s5501_s21 }
 0x22d   :  { %v296_v25 = vpop.permute.xlu0 %295 }
 0x22e   :  { %v5656_v26 = vadd.f32 %v296_v25, %v288_v24  ;;  %v106_v24 = vld [vmem:[#allocation7 + $0x40] sm:$0xff]  ;;  %v107_v25 = vld [vmem:[#allocation7 + $0x48] sm:$0xff] }
 0x22f   :  { %v5721_v28 = vpack.c.bf16 %v107_v25, %v106_v24 }
 0x230   :  { %5139 = vtanh.f32 %v5656_v26  ;;  %v392_v7 = vrot.slane %v5656_v26, 7  ;;  %v115_v26 = vld [vmem:[#allocation5 + $0x20] sm:$0xff] }
 0x23a   :  { %v5140_v27 = vpop.eup %5139 }
 0x23b   :  { %301 = vrot.lane.b32.xlu1 %v5140_v27, %s5501_s21  ;;  %v116_v27 = vld [vmem:[#allocation5 + $0x28] sm:$0xff] }
 0x2ad   :  { %v302_v34 = vpop.permute.xlu1 %301 }
 0x2ae   :  { %v304_v35 = vmul.f32 %v5138_v21, %v302_v34  ;;  %v5724_v34 = vpack.c.bf16 %v116_v27, %v115_v26 }
 0x2b0   :  { %306 = vrot.lane.b32.xlu1 %v304_v35, %s5502_s23  ;;  %v117_v35 = vld [vmem:[#allocation5 + $0x30] sm:$0xff] }
 0x2b1   :  { %v5736_v39 = vpack.c.bf16 %v118_v36, %v117_v35 }
 0x322   :  { %v307_v41 = vpop.permute.xlu1 %306 }
 0x323   :  { %4409 = vmatmul.mubr.msk.f32.vlgmr.msra.gmra.mrb[2].mxu0 %vm206_vm2, %v307_v41 }
 0x324   :  { %4882 = vmatpush3.bf16.msra.mxu0 %v5676_v38  ;;  %4430 = vmatprep.mubr.msk.f32.mxu0 %vm5500_vm0, %v5499_v1 }
 0x325   :  { %4883 = vmatprep.subr.bf16.mxu0 %v5498_v0 }
 0x328   :  { %4885 = vmatpush3.bf16.msra.mxu0 %v5680_v42 }
 0x329   :  { %4892 = vmatprep.subr.bf16.mxu0 %v5498_v0 }
 0x32b   :  { %4431 = vmatmul.mubr.msk.f32.vlgmr.msra.gmra.mrb[4].mxu0 %vm206_vm2, %v307_v41 }
 0x32c   :  { %4894 = vmatpush3.bf16.msra.mxu0 %v5660_v30  ;;  %4452 = vmatprep.mubr.msk.f32.mxu0 %vm5500_vm0, %v5499_v1 }
 0x32d   :  { %4895 = vmatprep.subr.bf16.mxu0 %v5498_v0 }
 0x330   :  { %4897 = vmatpush3.bf16.msra.mxu0 %v5664_v33 }
 0x331   :  { %4904 = vmatprep.subr.bf16.mxu0 %v5498_v0 }
 0x3f6   :  { %v376_v45 = vpop.f32.mrb[2].mxu0 }
 0x3f7   :  { %v381_v46 = vrot.slane %v376_v45, 7  ;;  %v4410_v47 = vpop.f32.mrb[3].mxu0 }
 0x3f9   :  { %v383_v48 = vadd.f32 %v381_v46, %v5651_v13 }
 0x3fb   :  { %5141 = vtanh.f32 %v383_v48  ;;  %v4100_v56 = vmul.f32 -1.442695, %v383_v48 }
 0x3fe   :  { %v547_v50 = vpop.f32.mrb[4].mxu0 }
 0x3ff   :  { %v548_v51 = vadd.f32 %v547_v50, %v477_v43  ;;  %v4432_v52 = vpop.f32.mrb[5].mxu0 }
 0x401   :  { %v551_v53 = vadd.f32 %v5698_v49, %v548_v51 }
 0x403   :  { %5143 = vtanh.f32 %v551_v53  ;;  %v4102_v57 = vmul.f32 -1.442695, %v551_v53 }
 0x404   :  { %5145 = vpow2.f32 %v4100_v56 }
 0x405   :  { %v5142_v54 = vpop.eup %5141  ;;  %5147 = vpow2.f32 %v4102_v57 }
 0x406   :  { %396 = vrot.lane.b32.xlu0 %v5142_v54, %s5501_s21 }
 0x40d   :  { %v5144_v55 = vpop.eup %5143 }
 0x40e   :  { %561 = vrot.lane.b32.xlu1 %v5144_v55, %s5501_s21  ;;  %v5146_v58 = vpop.eup %5145  ;;  %v5764_v55 = vld [vmem:[%s6201_s4 + $0x2] sm:$0x1] }
 0x40f   :  { %v387_v59 = vadd.f32 1.0, %v5146_v58  ;;  %v5148_v60 = vpop.eup %5147 }
 0x410   :  { %v555_v61 = vadd.f32 1.0, %v5148_v60 }
 0x411   :  { %5149 = vrcp.f32 %v387_v59 }
 0x412   :  { %5151 = vrcp.f32 %v555_v61 }
 0x41b   :  { %v5150_v62 = vpop.eup %5149 }
 0x41c   :  { %v5152_v3 = vpop.eup %5151  ;;  %v394_v8 = vmul.f32 %v5150_v62, %v392_v7 }
 0x41d   :  { %v559_v12 = vmul.f32 0.0, %v5152_v3 }
 0x478   :  { %v397_v63 = vpop.permute.xlu0 %396 }
 0x479   :  { %v399_v2 = vmul.f32 %v5150_v62, %v397_v63 }
 0x47b   :  { %401 = vrot.lane.b32.xlu0 %v399_v2, %s5501_s21 }
 0x480   :  { %v562_v4 = vpop.permute.xlu1 %561 }
 0x481   :  { %v564_v6 = vmul.f32 %v5152_v3, %v562_v4 }
 0x483   :  { %566 = vrot.lane.b32.xlu1 %v564_v6, %s5501_s21 }
 0x4ed   :  { %v402_v10 = vpop.permute.xlu0 %401 }
 0x4ee   :  { %v5706_v11 = vadd.f32 %v402_v10, %v394_v8 }
 0x4f0   :  { %5153 = vtanh.f32 %v5706_v11 }
 0x4f5   :  { %v567_v14 = vpop.permute.xlu1 %566 }
 0x4f6   :  { %v5709_v15 = vadd.f32 %v567_v14, %v559_v12 }
 0x4f8   :  { %5155 = vtanh.f32 %v5709_v15 }
 0x4fa   :  { %v5154_v16 = vpop.eup %5153 }
 0x4fb   :  { %407 = vrot.lane.b32.xlu0 %v5154_v16, %s5501_s21 }
 0x502   :  { %v5156_v17 = vpop.eup %5155 }
 0x503   :  { %572 = vrot.lane.b32.xlu1 %v5156_v17, %s5501_s21 }
 0x56d   :  { %v408_v18 = vpop.permute.xlu0 %407 }
 0x56e   :  { %v410_v19 = vmul.f32 %v5150_v62, %v408_v18 }
 0x570   :  { %v577_v20 = vrot.slane %v410_v19, 1 }
 0x572   :  { %578 = vrot.lane.b32.xlu0 %v577_v20, %s5502_s23 }
 0x575   :  { %v573_v21 = vpop.permute.xlu1 %572 }
 0x576   :  { %v575_v22 = vmul.f32 %v5152_v3, %v573_v21 }
 0x578   :  { %684 = vrot.lane.b32.xlu1 %v575_v22, %s5502_s23 }
 0x5e4   :  { %v579_v23 = vpop.permute.xlu0 %578 }
 0x5e5   :  { %4442 = vmatmul.mubr.msk.f32.vlgmr.msra.gmra.mrb[4].mxu1 %vm206_vm2, %v579_v23 }
 0x5e6   :  { %4900 = vmatpush3.bf16.msra.mxu1 %v5676_v38  ;;  %4463 = vmatprep.mubr.msk.f32.mxu1 %vm5500_vm0, %v5499_v1 }
 0x5e7   :  { %4901 = vmatprep.subr.bf16.mxu1 %v5498_v0 }
 0x5ea   :  { %4903 = vmatpush3.bf16.msra.mxu1 %v5680_v42  ;;  %v685_v32 = vpop.permute.xlu1 %684 }
 0x5eb   :  { %4453 = vmatmul.mubr.msk.f32.vlgmr.msra.gmra.mrb[6].mxu0 %vm206_vm2, %v685_v32  ;;  %4910 = vmatprep.subr.bf16.mxu1 %v5498_v0 }
 0x5ec   :  { %4906 = vmatpush3.bf16.msra.mxu0 %v5721_v28  ;;  %4474 = vmatprep.mubr.msk.f32.mxu0 %vm5500_vm0, %v5499_v1 }
 0x5ed   :  { %4464 = vmatmul.mubr.msk.f32.vlgmr.msra.gmra.mrb[6].mxu1 %vm206_vm2, %v579_v23  ;;  %4907 = vmatprep.subr.bf16.mxu0 %v5498_v0  ;;  %v664_v23 = vrot.slane %v5706_v11, 7 }
 0x5ee   :  { %4912 = vmatpush3.bf16.msra.mxu1 %v5724_v34  ;;  %4485 = vmatprep.mubr.msk.f32.mxu1 %vm5500_vm0, %v5499_v1 }
 0x5ef   :  { %4913 = vmatprep.subr.bf16.mxu1 %v5498_v0 }
 0x5f0   :  { %4909 = vmatpush3.bf16.msra.mxu0 %v5729_v37 }
 0x5f1   :  { %4916 = vmatprep.subr.bf16.mxu0 %v5498_v0 }
 0x5f2   :  { %4915 = vmatpush3.bf16.msra.mxu1 %v5736_v39 }
 0x5f3   :  { %4475 = vmatmul.mubr.f32.vlgmr.msra.gmra.mrb[8].mxu0 %v5499_v1  ;;  %4922 = vmatprep.subr.bf16.mxu1 %v5498_v0 }
 0x5f4   :  { %4918 = vmatpush3.bf16.msra.mxu0 %v5630_v5  ;;  %4496 = vmatprep.mubr.msk.f32.mxu0 %vm5500_vm0, %v5499_v1 }
 0x5f5   :  { %4486 = vmatmul.mubr.msk.f32.vlgmr.msra.gmra.mrb[8].mxu1 %vm206_vm2, %v685_v32  ;;  %4919 = vmatprep.subr.bf16.mxu0 %v5498_v0 }
 0x5f6   :  { %4924 = vmatpush3.bf16.msra.mxu1 %v5660_v30  ;;  %4507 = vmatprep.mubr.msk.f32.mxu1 %vm5500_vm0, %v5499_v1 }
 0x5f7   :  { %4925 = vmatprep.subr.bf16.mxu1 %v5498_v0 }
 0x5f8   :  { %4921 = vmatpush3.bf16.msra.mxu0 %v5634_v9 }
 0x5f9   :  { %4928 = vmatprep.subr.bf16.mxu0 %v5498_v0 }
 0x5fa   :  { %4927 = vmatpush3.bf16.msra.mxu1 %v5664_v33 }
 0x5fb   :  { %4934 = vmatprep.subr.bf16.mxu1 %v5498_v0 }
 0x6b8   :  { %v648_v40 = vpop.f32.mrb[4].mxu1 }
 0x6b9   :  { %v653_v41 = vrot.slane %v648_v40, 6  ;;  %v4443_v43 = vpop.f32.mrb[5].mxu1 }
 0x6bb   :  { %v655_v44 = vadd.f32 %v653_v41, %v5651_v13 }
 0x6bd   :  { %5157 = vtanh.f32 %v655_v44  ;;  %v4104_v62 = vmul.f32 -1.442695, %v655_v44 }
 0x6be   :  { %v754_v45 = vpop.f32.mrb[6].mxu0 }
 0x6bf   :  { %v4454_v46 = vpop.f32.mrb[7].mxu0 }
 0x6c0   :  { %v824_v47 = vpop.f32.mrb[6].mxu1 }
 0x6c1   :  { %v825_v48 = vadd.f32 %v824_v47, %v754_v45  ;;  %v4465_v50 = vpop.f32.mrb[7].mxu1 }
 0x6c3   :  { %v828_v51 = vadd.f32 %v5698_v49, %v825_v48 }
 0x6c5   :  { %5159 = vtanh.f32 %v828_v51  ;;  %v4107_v63 = vmul.f32 -1.442695, %v828_v51 }
 0x6c6   :  { %v919_v52 = vpop.f32.mrb[8].mxu0 }
 0x6c7   :  { %v5158_v53 = vpop.eup %5157  ;;  %v4476_v54 = vpop.f32.mrb[9].mxu0 }
 0x6c8   :  { %v989_v56 = vpop.f32.mrb[8].mxu1  ;;  %668 = vrot.lane.b32.xlu0 %v5158_v53, %s5501_s21 }
 0x6c9   :  { %v990_v57 = vadd.f32 %v989_v56, %v919_v52  ;;  %v4487_v58 = vpop.f32.mrb[9].mxu1 }
 0x6cb   :  { %v993_v59 = vadd.f32 %v5764_v55, %v990_v57 }
 0x6cd   :  { %5161 = vtanh.f32 %v993_v59  ;;  %v4109_v3 = vmul.f32 -1.442695, %v993_v59 }
 0x6ce   :  { %5163 = vpow2.f32 %v4104_v62 }
 0x6cf   :  { %v5160_v60 = vpop.eup %5159  ;;  %5165 = vpow2.f32 %v4107_v63 }
 0x6d0   :  { %838 = vrot.lane.b32.xlu1 %v5160_v60, %s5501_s21  ;;  %5167 = vpow2.f32 %v4109_v3 }
 0x6d7   :  { %v5162_v61 = vpop.eup %5161 }
 0x6d8   :  { %1003 = vrot.lane.b32.xlu0 %v5162_v61, %s5501_s21  ;;  %v5164_v2 = vpop.eup %5163 }
 0x6d9   :  { %v659_v4 = vadd.f32 1.0, %v5164_v2  ;;  %v5166_v6 = vpop.eup %5165 }
 0x6da   :  { %v832_v7 = vadd.f32 1.0, %v5166_v6  ;;  %v5168_v8 = vpop.eup %5167 }
 0x6db   :  { %5169 = vrcp.f32 %v659_v4  ;;  %v997_v16 = vadd.f32 1.0, %v5168_v8 }
 0x6dc   :  { %5171 = vrcp.f32 %v832_v7 }
 0x6dd   :  { %5173 = vrcp.f32 %v997_v16 }
 0x6e5   :  { %v5170_v10 = vpop.eup %5169 }
 0x6e6   :  { %v5172_v17 = vpop.eup %5171  ;;  %v666_v24 = vmul.f32 %v5170_v10, %v664_v23 }
 0x6e7   :  { %v5174_v20 = vpop.eup %5173  ;;  %v836_v27 = vmul.f32 %v5172_v17, %v5709_v15 }
 0x6e8   :  { %v1001_v35 = vmul.f32 0.0, %v5174_v20 }
 0x73a   :  { %v669_v12 = vpop.permute.xlu0 %668 }
 0x73b   :  { %v671_v14 = vmul.f32 %v5170_v10, %v669_v12 }
 0x73d   :  { %673 = vrot.lane.b32.xlu1 %v671_v14, %s5501_s21 }
 0x742   :  { %v839_v18 = vpop.permute.xlu1 %838 }
 0x743   :  { %v841_v19 = vmul.f32 %v5172_v17, %v839_v18 }
 0x745   :  { %843 = vrot.lane.b32.xlu0 %v841_v19, %s5501_s21 }
 0x74a   :  { %v1004_v21 = vpop.permute.xlu0 %1003 }
 0x74b   :  { %v1006_v22 = vmul.f32 %v5174_v20, %v1004_v21 }
 0x74d   :  { %1008 = vrot.lane.b32.xlu1 %v1006_v22, %s5501_s21 }
 0x7af   :  { %v674_v25 = vpop.permute.xlu1 %673 }
 0x7b0   :  { %v5774_v26 = vadd.f32 %v674_v25, %v666_v24 }
 0x7b2   :  { %5175 = vtanh.f32 %v5774_v26 }
 0x7b7   :  { %v844_v29 = vpop.permute.xlu0 %843 }
 0x7b8   :  { %v5778_v31 = vadd.f32 %v844_v29, %v836_v27 }
 0x7ba   :  { %5177 = vtanh.f32 %v5778_v31 }
 0x7bc   :  { %v5176_v32 = vpop.eup %5175 }
 0x7bd   :  { %679 = vrot.lane.b32.xlu0 %v5176_v32, %s5501_s21 }
 0x7bf   :  { %v1009_v36 = vpop.permute.xlu1 %1008 }
 0x7c0   :  { %v5782_v40 = vadd.f32 %v1009_v36, %v1001_v35 }
 0x7c2   :  { %5179 = vtanh.f32 %v5782_v40 }
 0x7c4   :  { %v5178_v11 = vpop.eup %5177 }
 0x7c5   :  { %849 = vrot.lane.b32.xlu1 %v5178_v11, %s5501_s21 }
 0x7cc   :  { %v5180_v41 = vpop.eup %5179 }
 0x7cd   :  { %1014 = vrot.lane.b32.xlu0 %v5180_v41, %s5501_s21 }
 0x82f   :  { %v680_v15 = vpop.permute.xlu0 %679 }
 0x830   :  { %v682_v43 = vmul.f32 %v5170_v10, %v680_v15 }
 0x832   :  { %v1019_v44 = vrot.slane %v682_v43, 2  ;;  %v1106_v43 = vrot.slane %v5774_v26, 7 }
 0x834   :  { %1020 = vrot.lane.b32.xlu1 %v1019_v44, %s5502_s23 }
 0x837   :  { %v850_v45 = vpop.permute.xlu1 %849 }
 0x838   :  { %v852_v46 = vmul.f32 %v5172_v17, %v850_v45 }
 0x83a   :  { %1126 = vrot.lane.b32.xlu0 %v852_v46, %s5502_s23 }
 0x83f   :  { %v1015_v47 = vpop.permute.xlu0 %1014 }
 0x840   :  { %v1017_v48 = vmul.f32 %v5174_v20, %v1015_v47 }
 0x842   :  { %1296 = vrot.lane.b32.xlu1 %v1017_v48, %s5502_s23 }
 0x8a6   :  { %v1021_v50 = vpop.permute.xlu1 %1020 }
 0x8a7   :  { %4497 = vmatmul.mubr.msk.f32.vlgmr.msra.gmra.mrb[10].mxu0 %vm206_vm2, %v1021_v50 }
 0x8a8   :  { %4930 = vmatpush3.bf16.msra.mxu0 %v5676_v38  ;;  %4518 = vmatprep.mubr.msk.f32.mxu0 %vm5500_vm0, %v5499_v1 }
 0x8a9   :  { %4931 = vmatprep.subr.bf16.mxu0 %v5498_v0 }
 0x8ac   :  { %4933 = vmatpush3.bf16.msra.mxu0 %v5680_v42  ;;  %v1127_v51 = vpop.permute.xlu0 %1126 }
 0x8ad   :  { %4508 = vmatmul.mubr.msk.f32.vlgmr.msra.gmra.mrb[10].mxu1 %vm206_vm2, %v1127_v51  ;;  %4940 = vmatprep.subr.bf16.mxu0 %v5498_v0 }
 0x8ae   :  { %4936 = vmatpush3.bf16.msra.mxu1 %v5721_v28  ;;  %4529 = vmatprep.mubr.msk.f32.mxu1 %vm5500_vm0, %v5499_v1 }
 0x8af   :  { %4519 = vmatmul.mubr.msk.f32.vlgmr.msra.gmra.mrb[12].mxu0 %vm206_vm2, %v1021_v50  ;;  %4937 = vmatprep.subr.bf16.mxu1 %v5498_v0 }
 0x8b0   :  { %4942 = vmatpush3.bf16.msra.mxu0 %v5724_v34  ;;  %4540 = vmatprep.mubr.msk.f32.mxu0 %vm5500_vm0, %v5499_v1 }
 0x8b1   :  { %4943 = vmatprep.subr.bf16.mxu0 %v5498_v0 }
 0x8b2   :  { %4939 = vmatpush3.bf16.msra.mxu1 %v5729_v37 }
 0x8b3   :  { %4946 = vmatprep.subr.bf16.mxu1 %v5498_v0 }
 0x8b4   :  { %4945 = vmatpush3.bf16.msra.mxu0 %v5736_v39  ;;  %v1297_v52 = vpop.permute.xlu1 %1296 }
 0x8b5   :  { %4530 = vmatmul.mubr.msk.f32.vlgmr.msra.gmra.mrb[12].mxu1 %vm206_vm2, %v1297_v52  ;;  %4952 = vmatprep.subr.bf16.mxu0 %v5498_v0 }
 0x8b6   :  { %4948 = vmatpush3.bf16.msra.mxu1 %v5630_v5  ;;  %4551 = vmatprep.mubr.msk.f32.mxu1 %vm5500_vm0, %v5499_v1 }
 0x8b7   :  { %4541 = vmatmul.mubr.msk.f32.vlgmr.msra.gmra.mrb[14].mxu0 %vm206_vm2, %v1127_v51  ;;  %4949 = vmatprep.subr.bf16.mxu1 %v5498_v0 }
 0x8b8   :  { %4954 = vmatpush3.bf16.msra.mxu0 %v5660_v30  ;;  %4562 = vmatprep.mubr.msk.f32.mxu0 %vm5500_vm0, %v5499_v1 }
 0x8b9   :  { %4955 = vmatprep.subr.bf16.mxu0 %v5498_v0 }
 0x8ba   :  { %4951 = vmatpush3.bf16.msra.mxu1 %v5634_v9 }
 0x8bb   :  { %4958 = vmatprep.subr.bf16.mxu1 %v5498_v0 }
 0x8bc   :  { %4957 = vmatpush3.bf16.msra.mxu0 %v5664_v33 }
 0x8bd   :  { %4964 = vmatprep.subr.bf16.mxu0 %v5498_v0 }
 0x97a   :  { %v1090_v53 = vpop.f32.mrb[10].mxu0 }
 0x97b   :  { %v1095_v54 = vrot.slane %v1090_v53, 5  ;;  %v4498_v56 = vpop.f32.mrb[11].mxu0 }
 0x97d   :  { %v1097_v57 = vadd.f32 %v1095_v54, %v5651_v13 }
 0x97f   :  { %5181 = vtanh.f32 %v1097_v57  ;;  %v4111_v16 = vmul.f32 -1.442695, %v1097_v57 }
 0x980   :  { %v1196_v58 = vpop.f32.mrb[10].mxu1 }
 0x981   :  { %v4509_v59 = vpop.f32.mrb[11].mxu1 }
 0x982   :  { %v1266_v60 = vpop.f32.mrb[12].mxu0 }
 0x983   :  { %v1267_v61 = vadd.f32 %v1266_v60, %v1196_v58  ;;  %v4520_v62 = vpop.f32.mrb[13].mxu0 }
 0x985   :  { %v1270_v63 = vadd.f32 %v5698_v49, %v1267_v61 }
 0x987   :  { %5183 = vtanh.f32 %v1270_v63  ;;  %v4114_v17 = vmul.f32 -1.442695, %v1270_v63 }
 0x988   :  { %v1366_v2 = vpop.f32.mrb[12].mxu1 }
 0x989   :  { %v5182_v3 = vpop.eup %5181  ;;  %v4531_v4 = vpop.f32.mrb[13].mxu1 }
 0x98a   :  { %v1436_v6 = vpop.f32.mrb[14].mxu0  ;;  %1110 = vrot.lane.b32.xlu0 %v5182_v3, %s5501_s21 }
 0x98b   :  { %v1437_v7 = vadd.f32 %v1436_v6, %v1366_v2  ;;  %v4542_v8 = vpop.f32.mrb[15].mxu0 }
 0x98d   :  { %v1440_v10 = vadd.f32 %v5764_v55, %v1437_v7 }
 0x98f   :  { %5185 = vtanh.f32 %v1440_v10  ;;  %v4117_v19 = vmul.f32 -1.442695, %v1440_v10 }
 0x990   :  { %5187 = vpow2.f32 %v4111_v16 }
 0x991   :  { %v5184_v12 = vpop.eup %5183  ;;  %5189 = vpow2.f32 %v4114_v17 }
 0x992   :  { %1280 = vrot.lane.b32.xlu1 %v5184_v12, %s5501_s21  ;;  %5191 = vpow2.f32 %v4117_v19 }
 0x999   :  { %v5186_v14 = vpop.eup %5185 }
 0x99a   :  { %1450 = vrot.lane.b32.xlu0 %v5186_v14, %s5501_s21  ;;  %v5188_v18 = vpop.eup %5187 }
 0x99b   :  { %v1101_v20 = vadd.f32 1.0, %v5188_v18  ;;  %v5190_v21 = vpop.eup %5189 }
 0x99c   :  { %v1274_v22 = vadd.f32 1.0, %v5190_v21  ;;  %v5192_v23 = vpop.eup %5191 }
 0x99d   :  { %5193 = vrcp.f32 %v1101_v20  ;;  %v1444_v29 = vadd.f32 1.0, %v5192_v23 }
 0x99e   :  { %5195 = vrcp.f32 %v1274_v22 }
 0x99f   :  { %5197 = vrcp.f32 %v1444_v29 }
 0x9a7   :  { %v5194_v24 = vpop.eup %5193 }
 0x9a8   :  { %v5196_v32 = vpop.eup %5195  ;;  %v1108_v44 = vmul.f32 %v5194_v24, %v1106_v43 }
 0x9a9   :  { %v5198_v11 = vpop.eup %5197  ;;  %v1278_v47 = vmul.f32 %v5196_v32, %v5778_v31 }
 0x9aa   :  { %v1448_v52 = vmul.f32 %v5198_v11, %v5782_v40 }
 0x9fc   :  { %v1111_v25 = vpop.permute.xlu0 %1110 }
 0x9fd   :  { %v1113_v27 = vmul.f32 %v5194_v24, %v1111_v25 }
 0x9ff   :  { %1115 = vrot.lane.b32.xlu1 %v1113_v27, %s5501_s21 }
 0xa04   :  { %v1281_v35 = vpop.permute.xlu1 %1280 }
 0xa05   :  { %v1283_v36 = vmul.f32 %v5196_v32, %v1281_v35 }
 0xa07   :  { %1285 = vrot.lane.b32.xlu0 %v1283_v36, %s5501_s21 }
 0xa0c   :  { %v1451_v41 = vpop.permute.xlu0 %1450 }
 0xa0d   :  { %v1453_v15 = vmul.f32 %v5198_v11, %v1451_v41 }
 0xa0f   :  { %1455 = vrot.lane.b32.xlu1 %v1453_v15, %s5501_s21 }
 0xa71   :  { %v1116_v45 = vpop.permute.xlu1 %1115 }
 0xa72   :  { %v5835_v46 = vadd.f32 %v1116_v45, %v1108_v44 }
 0xa74   :  { %5199 = vtanh.f32 %v5835_v46 }
 0xa79   :  { %v1286_v48 = vpop.permute.xlu0 %1285 }
 0xa7a   :  { %v5839_v50 = vadd.f32 %v1286_v48, %v1278_v47 }
 0xa7c   :  { %5201 = vtanh.f32 %v5839_v50 }
 0xa7e   :  { %v5200_v51 = vpop.eup %5199 }
 0xa7f   :  { %1121 = vrot.lane.b32.xlu0 %v5200_v51, %s5501_s21 }
 0xa81   :  { %v1456_v53 = vpop.permute.xlu1 %1455 }
 0xa82   :  { %v5844_v26 = vadd.f32 %v1456_v53, %v1448_v52 }
 0xa84   :  { %5203 = vtanh.f32 %v5844_v26 }
 0xa86   :  { %v5202_v54 = vpop.eup %5201 }
 0xa87   :  { %1291 = vrot.lane.b32.xlu1 %v5202_v54, %s5501_s21 }
 0xa8e   :  { %v5204_v56 = vpop.eup %5203 }
 0xa8f   :  { %1461 = vrot.lane.b32.xlu0 %v5204_v56, %s5501_s21 }
 0xaf1   :  { %v1122_v31 = vpop.permute.xlu0 %1121 }
 0xaf2   :  { %v1124_v57 = vmul.f32 %v5194_v24, %v1122_v31 }
 0xaf4   :  { %v1466_v58 = vrot.slane %v1124_v57, 3  ;;  %v1553_v57 = vrot.slane %v5835_v46, 7 }
 0xaf6   :  { %1467 = vrot.lane.b32.xlu1 %v1466_v58, %s5502_s23 }
 0xaf9   :  { %v1292_v59 = vpop.permute.xlu1 %1291 }
 0xafa   :  { %v1294_v60 = vmul.f32 %v5196_v32, %v1292_v59 }
 0xafc   :  { %1573 = vrot.lane.b32.xlu0 %v1294_v60, %s5502_s23 }
 0xb01   :  { %v1462_v40 = vpop.permute.xlu0 %1461 }
 0xb02   :  { %v1464_v61 = vmul.f32 %v5198_v11, %v1462_v40 }
 0xb04   :  { %1743 = vrot.lane.b32.xlu1 %v1464_v61, %s5502_s23 }
 0xb68   :  { %v1468_v62 = vpop.permute.xlu1 %1467 }
 0xb69   :  { %4552 = vmatmul.mubr.msk.f32.vlgmr.msra.gmra.mrb[14].mxu1 %vm206_vm2, %v1468_v62 }
 0xb6a   :  { %4960 = vmatpush3.bf16.msra.mxu1 %v5676_v38  ;;  %4573 = vmatprep.mubr.msk.f32.mxu1 %vm5500_vm0, %v5499_v1 }
 0xb6b   :  { %4961 = vmatprep.subr.bf16.mxu1 %v5498_v0 }
 0xb6e   :  { %4963 = vmatpush3.bf16.msra.mxu1 %v5680_v42  ;;  %v1574_v63 = vpop.permute.xlu0 %1573 }
 0xb6f   :  { %4563 = vmatmul.mubr.msk.f32.vlgmr.msra.gmra.mrb[16].mxu0 %vm206_vm2, %v1574_v63  ;;  %4970 = vmatprep.subr.bf16.mxu1 %v5498_v0 }
 0xb70   :  { %4966 = vmatpush3.bf16.msra.mxu0 %v5721_v28  ;;  %4584 = vmatprep.mubr.msk.f32.mxu0 %vm5500_vm0, %v5499_v1 }
 0xb71   :  { %4574 = vmatmul.mubr.msk.f32.vlgmr.msra.gmra.mrb[16].mxu1 %vm206_vm2, %v1468_v62  ;;  %4967 = vmatprep.subr.bf16.mxu0 %v5498_v0 }
 0xb72   :  { %4972 = vmatpush3.bf16.msra.mxu1 %v5724_v34  ;;  %4595 = vmatprep.mubr.msk.f32.mxu1 %vm5500_vm0, %v5499_v1 }
 0xb73   :  { %4973 = vmatprep.subr.bf16.mxu1 %v5498_v0 }
 0xb74   :  { %4969 = vmatpush3.bf16.msra.mxu0 %v5729_v37 }
 0xb75   :  { %4976 = vmatprep.subr.bf16.mxu0 %v5498_v0 }
 0xb76   :  { %4975 = vmatpush3.bf16.msra.mxu1 %v5736_v39  ;;  %v1744_v2 = vpop.permute.xlu1 %1743 }
 0xb77   :  { %4585 = vmatmul.mubr.msk.f32.vlgmr.msra.gmra.mrb[18].mxu0 %vm206_vm2, %v1744_v2  ;;  %4982 = vmatprep.subr.bf16.mxu1 %v5498_v0 }
 0xb78   :  { %4978 = vmatpush3.bf16.msra.mxu0 %v5630_v5  ;;  %4606 = vmatprep.mubr.msk.f32.mxu0 %vm5500_vm0, %v5499_v1 }
 0xb79   :  { %4596 = vmatmul.mubr.msk.f32.vlgmr.msra.gmra.mrb[18].mxu1 %vm206_vm2, %v1574_v63  ;;  %4979 = vmatprep.subr.bf16.mxu0 %v5498_v0 }
 0xb7a   :  { %4984 = vmatpush3.bf16.msra.mxu1 %v5660_v30  ;;  %4617 = vmatprep.mubr.msk.f32.mxu1 %vm5500_vm0, %v5499_v1 }
 0xb7b   :  { %4985 = vmatprep.subr.bf16.mxu1 %v5498_v0 }
 0xb7c   :  { %4981 = vmatpush3.bf16.msra.mxu0 %v5634_v9 }
 0xb7d   :  { %4988 = vmatprep.subr.bf16.mxu0 %v5498_v0 }
 0xb7e   :  { %4987 = vmatpush3.bf16.msra.mxu1 %v5664_v33 }
 0xb7f   :  { %4994 = vmatprep.subr.bf16.mxu1 %v5498_v0 }
 0xc3c   :  { %v1537_v3 = vpop.f32.mrb[14].mxu1 }
 0xc3d   :  { %v1542_v4 = vrot.slane %v1537_v3, 4  ;;  %v4553_v6 = vpop.f32.mrb[15].mxu1 }
 0xc3f   :  { %v1544_v7 = vadd.f32 %v1542_v4, %v5651_v13 }
 0xc41   :  { %5205 = vtanh.f32 %v1544_v7  ;;  %v4119_v29 = vmul.f32 -1.442695, %v1544_v7 }
 0xc42   :  { %v1643_v8 = vpop.f32.mrb[16].mxu0 }
 0xc43   :  { %v4564_v10 = vpop.f32.mrb[17].mxu0 }
 0xc44   :  { %v1713_v12 = vpop.f32.mrb[16].mxu1 }
 0xc45   :  { %v1714_v14 = vadd.f32 %v1713_v12, %v1643_v8  ;;  %v4575_v16 = vpop.f32.mrb[17].mxu1 }
 0xc47   :  { %v1717_v17 = vadd.f32 %v5698_v49, %v1714_v14 }
 0xc49   :  { %5207 = vtanh.f32 %v1717_v17  ;;  %v4122_v32 = vmul.f32 -1.442695, %v1717_v17 }
 0xc4a   :  { %v1813_v18 = vpop.f32.mrb[18].mxu0 }
 0xc4b   :  { %v5206_v19 = vpop.eup %5205  ;;  %v4586_v20 = vpop.f32.mrb[19].mxu0 }
 0xc4c   :  { %v1883_v21 = vpop.f32.mrb[18].mxu1  ;;  %1557 = vrot.lane.b32.xlu0 %v5206_v19, %s5501_s21 }
 0xc4d   :  { %v1884_v22 = vadd.f32 %v1883_v21, %v1813_v18  ;;  %v4597_v23 = vpop.f32.mrb[19].mxu1 }
 0xc4f   :  { %v1887_v24 = vadd.f32 %v5764_v55, %v1884_v22 }
 0xc51   :  { %5209 = vtanh.f32 %v1887_v24  ;;  %v4125_v36 = vmul.f32 -1.442695, %v1887_v24 }
 0xc52   :  { %5211 = vpow2.f32 %v4119_v29 }
 0xc53   :  { %v5208_v25 = vpop.eup %5207  ;;  %5213 = vpow2.f32 %v4122_v32 }
 0xc54   :  { %1727 = vrot.lane.b32.xlu1 %v5208_v25, %s5501_s21  ;;  %5215 = vpow2.f32 %v4125_v36 }
 0xc5b   :  { %v5210_v27 = vpop.eup %5209 }
 0xc5c   :  { %1897 = vrot.lane.b32.xlu0 %v5210_v27, %s5501_s21  ;;  %v5212_v35 = vpop.eup %5211 }
 0xc5d   :  { %v1548_v11 = vadd.f32 1.0, %v5212_v35  ;;  %v5214_v41 = vpop.eup %5213 }
 0xc5e   :  { %v1721_v15 = vadd.f32 1.0, %v5214_v41  ;;  %v5216_v43 = vpop.eup %5215 }
 0xc5f   :  { %5217 = vrcp.f32 %v1548_v11  ;;  %v1891_v48 = vadd.f32 1.0, %v5216_v43 }
 0xc60   :  { %5219 = vrcp.f32 %v1721_v15 }
 0xc61   :  { %5221 = vrcp.f32 %v1891_v48 }
 0xc69   :  { %v5218_v44 = vpop.eup %5217 }
 0xc6a   :  { %v5220_v51 = vpop.eup %5219  ;;  %v1555_v58 = vmul.f32 %v5218_v44, %v1553_v57 }
 0xc6b   :  { %v5222_v54 = vpop.eup %5221  ;;  %v1725_v40 = vmul.f32 %v5220_v51, %v5839_v50 }
 0xc6c   :  { %v1895_v2 = vmul.f32 %v5222_v54, %v5844_v26 }
 0xcbe   :  { %v1558_v45 = vpop.permute.xlu0 %1557 }
 0xcbf   :  { %v1560_v47 = vmul.f32 %v5218_v44, %v1558_v45 }
 0xcc1   :  { %1562 = vrot.lane.b32.xlu1 %v1560_v47, %s5501_s21 }
 0xcc6   :  { %v1728_v52 = vpop.permute.xlu1 %1727 }
 0xcc7   :  { %v1730_v53 = vmul.f32 %v5220_v51, %v1728_v52 }
 0xcc9   :  { %1732 = vrot.lane.b32.xlu0 %v1730_v53, %s5501_s21 }
 0xcce   :  { %v1898_v56 = vpop.permute.xlu0 %1897 }
 0xccf   :  { %v1900_v31 = vmul.f32 %v5222_v54, %v1898_v56 }
 0xcd1   :  { %1902 = vrot.lane.b32.xlu1 %v1900_v31, %s5501_s21 }
 0xd33   :  { %v1563_v59 = vpop.permute.xlu1 %1562 }
 0xd34   :  { %v5897_v60 = vadd.f32 %v1563_v59, %v1555_v58 }
 0xd36   :  { %5223 = vtanh.f32 %v5897_v60 }
 0xd3b   :  { %v1733_v61 = vpop.permute.xlu0 %1732 }
 0xd3c   :  { %v5901_v62 = vadd.f32 %v1733_v61, %v1725_v40 }
 0xd3e   :  { %5225 = vtanh.f32 %v5901_v62 }
 0xd40   :  { %v5224_v63 = vpop.eup %5223 }
 0xd41   :  { %1568 = vrot.lane.b32.xlu0 %v5224_v63, %s5501_s21 }
 0xd43   :  { %v1903_v3 = vpop.permute.xlu1 %1902 }
 0xd44   :  { %v5906_v46 = vadd.f32 %v1903_v3, %v1895_v2 }
 0xd46   :  { %5227 = vtanh.f32 %v5906_v46 }
 0xd48   :  { %v5226_v4 = vpop.eup %5225 }
 0xd49   :  { %1738 = vrot.lane.b32.xlu1 %v5226_v4, %s5501_s21 }
 0xd50   :  { %v5228_v6 = vpop.eup %5227 }
 0xd51   :  { %1908 = vrot.lane.b32.xlu0 %v5228_v6, %s5501_s21 }
 0xdb3   :  { %v1569_v50 = vpop.permute.xlu0 %1568 }
 0xdb4   :  { %v1571_v7 = vmul.f32 %v5218_v44, %v1569_v50  ;;  %v2000_v50 = vrot.slane %v5897_v60, 7 }
 0xdb6   :  { %v1913_v8 = vrot.slane %v1571_v7, 4 }
 0xdb8   :  { %1914 = vrot.lane.b32.xlu1 %v1913_v8, %s5502_s23 }
 0xdbb   :  { %v1739_v10 = vpop.permute.xlu1 %1738 }
 0xdbc   :  { %v1741_v12 = vmul.f32 %v5220_v51, %v1739_v10 }
 0xdbe   :  { %2020 = vrot.lane.b32.xlu0 %v1741_v12, %s5502_s23 }
 0xdc3   :  { %v1909_v26 = vpop.permute.xlu0 %1908 }
 0xdc4   :  { %v1911_v14 = vmul.f32 %v5222_v54, %v1909_v26 }
 0xdc6   :  { %2190 = vrot.lane.b32.xlu1 %v1911_v14, %s5502_s23 }
 0xe2a   :  { %v1915_v16 = vpop.permute.xlu1 %1914 }
 0xe2b   :  { %4607 = vmatmul.mubr.msk.f32.vlgmr.msra.gmra.mrb[20].mxu0 %vm206_vm2, %v1915_v16 }
 0xe2c   :  { %4990 = vmatpush3.bf16.msra.mxu0 %v5676_v38  ;;  %4628 = vmatprep.mubr.msk.f32.mxu0 %vm5500_vm0, %v5499_v1 }
 0xe2d   :  { %4991 = vmatprep.subr.bf16.mxu0 %v5498_v0 }
 0xe30   :  { %4993 = vmatpush3.bf16.msra.mxu0 %v5680_v42  ;;  %v2021_v17 = vpop.permute.xlu0 %2020 }
 0xe31   :  { %4618 = vmatmul.mubr.msk.f32.vlgmr.msra.gmra.mrb[20].mxu1 %vm206_vm2, %v2021_v17  ;;  %5000 = vmatprep.subr.bf16.mxu0 %v5498_v0 }
 0xe32   :  { %4996 = vmatpush3.bf16.msra.mxu1 %v5721_v28  ;;  %4639 = vmatprep.mubr.msk.f32.mxu1 %vm5500_vm0, %v5499_v1 }
 0xe33   :  { %4629 = vmatmul.mubr.msk.f32.vlgmr.msra.gmra.mrb[22].mxu0 %vm206_vm2, %v1915_v16  ;;  %4997 = vmatprep.subr.bf16.mxu1 %v5498_v0 }
 0xe34   :  { %5002 = vmatpush3.bf16.msra.mxu0 %v5724_v34  ;;  %4650 = vmatprep.mubr.msk.f32.mxu0 %vm5500_vm0, %v5499_v1 }
 0xe35   :  { %5003 = vmatprep.subr.bf16.mxu0 %v5498_v0 }
 0xe36   :  { %4999 = vmatpush3.bf16.msra.mxu1 %v5729_v37 }
 0xe37   :  { %5006 = vmatprep.subr.bf16.mxu1 %v5498_v0 }
 0xe38   :  { %5005 = vmatpush3.bf16.msra.mxu0 %v5736_v39  ;;  %v2191_v18 = vpop.permute.xlu1 %2190 }
 0xe39   :  { %4640 = vmatmul.mubr.msk.f32.vlgmr.msra.gmra.mrb[22].mxu1 %vm206_vm2, %v2191_v18  ;;  %5012 = vmatprep.subr.bf16.mxu0 %v5498_v0 }
 0xe3a   :  { %5008 = vmatpush3.bf16.msra.mxu1 %v5630_v5  ;;  %4661 = vmatprep.mubr.msk.f32.mxu1 %vm5500_vm0, %v5499_v1 }
 0xe3b   :  { %4651 = vmatmul.mubr.msk.f32.vlgmr.msra.gmra.mrb[24].mxu0 %vm206_vm2, %v2021_v17  ;;  %5009 = vmatprep.subr.bf16.mxu1 %v5498_v0 }
 0xe3c   :  { %5014 = vmatpush3.bf16.msra.mxu0 %v5660_v30  ;;  %4672 = vmatprep.mubr.msk.f32.mxu0 %vm5500_vm0, %v5499_v1 }
 0xe3d   :  { %5015 = vmatprep.subr.bf16.mxu0 %v5498_v0 }
 0xe3e   :  { %5011 = vmatpush3.bf16.msra.mxu1 %v5634_v9 }
 0xe3f   :  { %5018 = vmatprep.subr.bf16.mxu1 %v5498_v0 }
 0xe40   :  { %5017 = vmatpush3.bf16.msra.mxu0 %v5664_v33 }
 0xe41   :  { %5024 = vmatprep.subr.bf16.mxu0 %v5498_v0 }
 0xefe   :  { %v1984_v19 = vpop.f32.mrb[20].mxu0 }
 0xeff   :  { %v1989_v20 = vrot.slane %v1984_v19, 3  ;;  %v4608_v21 = vpop.f32.mrb[21].mxu0 }
 0xf01   :  { %v1991_v22 = vadd.f32 %v1989_v20, %v5651_v13 }
 0xf03   :  { %5229 = vtanh.f32 %v1991_v22  ;;  %v4127_v48 = vmul.f32 -1.442695, %v1991_v22 }
 0xf04   :  { %v2090_v23 = vpop.f32.mrb[20].mxu1 }
 0xf05   :  { %v4619_v24 = vpop.f32.mrb[21].mxu1 }
 0xf06   :  { %v2160_v25 = vpop.f32.mrb[22].mxu0 }
 0xf07   :  { %v2161_v27 = vadd.f32 %v2160_v25, %v2090_v23  ;;  %v4630_v29 = vpop.f32.mrb[23].mxu0 }
 0xf09   :  { %v2164_v32 = vadd.f32 %v5698_v49, %v2161_v27 }
 0xf0b   :  { %5231 = vtanh.f32 %v2164_v32  ;;  %v4130_v49 = vmul.f32 -1.442695, %v2164_v32 }
 0xf0c   :  { %v2260_v35 = vpop.f32.mrb[22].mxu1 }
 0xf0d   :  { %v5230_v36 = vpop.eup %5229  ;;  %v4641_v11 = vpop.f32.mrb[23].mxu1 }
 0xf0e   :  { %v2330_v41 = vpop.f32.mrb[24].mxu0  ;;  %2004 = vrot.lane.b32.xlu0 %v5230_v36, %s5501_s21 }
 0xf0f   :  { %v2331_v15 = vadd.f32 %v2330_v41, %v2260_v35  ;;  %v4652_v43 = vpop.f32.mrb[25].mxu0 }
 0xf11   :  { %v2334_v44 = vadd.f32 %v5764_v55, %v2331_v15 }
 0xf13   :  { %5233 = vtanh.f32 %v2334_v44  ;;  %v4133_v52 = vmul.f32 -1.442695, %v2334_v44 }
 0xf14   :  { %5235 = vpow2.f32 %v4127_v48 }
 0xf15   :  { %v5232_v45 = vpop.eup %5231  ;;  %5237 = vpow2.f32 %v4130_v49 }
 0xf16   :  { %2174 = vrot.lane.b32.xlu1 %v5232_v45, %s5501_s21  ;;  %5239 = vpow2.f32 %v4133_v52 }
 0xf1d   :  { %v5234_v47 = vpop.eup %5233 }
 0xf1e   :  { %2344 = vrot.lane.b32.xlu0 %v5234_v47, %s5501_s21  ;;  %v5236_v51 = vpop.eup %5235 }
 0xf1f   :  { %v1995_v53 = vadd.f32 1.0, %v5236_v51  ;;  %v5238_v54 = vpop.eup %5237 }
 0xf20   :  { %v2168_v56 = vadd.f32 1.0, %v5238_v54  ;;  %v5240_v31 = vpop.eup %5239 }
 0xf21   :  { %5241 = vrcp.f32 %v1995_v53  ;;  %v2338_v40 = vadd.f32 1.0, %v5240_v31 }
 0xf22   :  { %5243 = vrcp.f32 %v2168_v56 }
 0xf23   :  { %5245 = vrcp.f32 %v2338_v40 }
 0xf2b   :  { %v5242_v57 = vpop.eup %5241 }
 0xf2c   :  { %v5244_v61 = vpop.eup %5243  ;;  %v2002_v7 = vmul.f32 %v5242_v57, %v2000_v50 }
 0xf2d   :  { %v5246_v3 = vpop.eup %5245  ;;  %v2172_v12 = vmul.f32 %v5244_v61, %v5901_v62 }
 0xf2e   :  { %v2342_v17 = vmul.f32 %v5246_v3, %v5906_v46 }
 0xf80   :  { %v2005_v58 = vpop.permute.xlu0 %2004 }
 0xf81   :  { %v2007_v59 = vmul.f32 %v5242_v57, %v2005_v58 }
 0xf83   :  { %2009 = vrot.lane.b32.xlu1 %v2007_v59, %s5501_s21 }
 0xf88   :  { %v2175_v63 = vpop.permute.xlu1 %2174 }
 0xf89   :  { %v2177_v2 = vmul.f32 %v5244_v61, %v2175_v63 }
 0xf8b   :  { %2179 = vrot.lane.b32.xlu0 %v2177_v2, %s5501_s21 }
 0xf90   :  { %v2345_v4 = vpop.permute.xlu0 %2344 }
 0xf91   :  { %v2347_v6 = vmul.f32 %v5246_v3, %v2345_v4 }
 0xf93   :  { %2349 = vrot.lane.b32.xlu1 %v2347_v6, %s5501_s21 }
 0xff5   :  { %v2010_v8 = vpop.permute.xlu1 %2009 }
 0xff6   :  { %v5959_v10 = vadd.f32 %v2010_v8, %v2002_v7 }
 0xff8   :  { %5247 = vtanh.f32 %v5959_v10 }
 0xffd   :  { %v2180_v26 = vpop.permute.xlu0 %2179 }
 0xffe   :  { %v5963_v14 = vadd.f32 %v2180_v26, %v2172_v12 }
0x1000   :  { %5249 = vtanh.f32 %v5963_v14 }
0x1002   :  { %v5248_v16 = vpop.eup %5247 }
0x1003   :  { %2015 = vrot.lane.b32.xlu0 %v5248_v16, %s5501_s21 }
0x1005   :  { %v2350_v18 = vpop.permute.xlu1 %2349 }
0x1006   :  { %v5968_v60 = vadd.f32 %v2350_v18, %v2342_v17 }
0x1008   :  { %5251 = vtanh.f32 %v5968_v60 }
0x100a   :  { %v5250_v19 = vpop.eup %5249 }
0x100b   :  { %2185 = vrot.lane.b32.xlu1 %v5250_v19, %s5501_s21  ;;  %v2447_v19 = vrot.slane %v5959_v10, 7 }
0x1012   :  { %v5252_v20 = vpop.eup %5251 }
0x1013   :  { %2355 = vrot.lane.b32.xlu0 %v5252_v20, %s5501_s21 }
0x1075   :  { %v2016_v62 = vpop.permute.xlu0 %2015 }
0x1076   :  { %v2018_v21 = vmul.f32 %v5242_v57, %v2016_v62 }
0x1078   :  { %v2360_v22 = vrot.slane %v2018_v21, 5 }
0x107a   :  { %2361 = vrot.lane.b32.xlu1 %v2360_v22, %s5502_s23 }
0x107d   :  { %v2186_v23 = vpop.permute.xlu1 %2185 }
0x107e   :  { %v2188_v24 = vmul.f32 %v5244_v61, %v2186_v23 }
0x1080   :  { %2467 = vrot.lane.b32.xlu0 %v2188_v24, %s5502_s23 }
0x1085   :  { %v2356_v46 = vpop.permute.xlu0 %2355 }
0x1086   :  { %v2358_v25 = vmul.f32 %v5246_v3, %v2356_v46 }
0x1088   :  { %2637 = vrot.lane.b32.xlu1 %v2358_v25, %s5502_s23 }
0x10ec   :  { %v2362_v27 = vpop.permute.xlu1 %2361 }
0x10ed   :  { %4662 = vmatmul.mubr.msk.f32.vlgmr.msra.gmra.mrb[24].mxu1 %vm206_vm2, %v2362_v27 }
0x10ee   :  { %5020 = vmatpush3.bf16.msra.mxu1 %v5676_v38  ;;  %4683 = vmatprep.mubr.msk.f32.mxu1 %vm5500_vm0, %v5499_v1 }
0x10ef   :  { %5021 = vmatprep.subr.bf16.mxu1 %v5498_v0 }
0x10f2   :  { %5023 = vmatpush3.bf16.msra.mxu1 %v5680_v42  ;;  %v2468_v29 = vpop.permute.xlu0 %2467 }
0x10f3   :  { %4673 = vmatmul.mubr.msk.f32.vlgmr.msra.gmra.mrb[26].mxu0 %vm206_vm2, %v2468_v29  ;;  %5030 = vmatprep.subr.bf16.mxu1 %v5498_v0 }
0x10f4   :  { %5026 = vmatpush3.bf16.msra.mxu0 %v5721_v28  ;;  %4694 = vmatprep.mubr.msk.f32.mxu0 %vm5500_vm0, %v5499_v1 }
0x10f5   :  { %4684 = vmatmul.mubr.msk.f32.vlgmr.msra.gmra.mrb[26].mxu1 %vm206_vm2, %v2362_v27  ;;  %5027 = vmatprep.subr.bf16.mxu0 %v5498_v0 }
0x10f6   :  { %5032 = vmatpush3.bf16.msra.mxu1 %v5724_v34  ;;  %4705 = vmatprep.mubr.msk.f32.mxu1 %vm5500_vm0, %v5499_v1 }
0x10f7   :  { %5033 = vmatprep.subr.bf16.mxu1 %v5498_v0 }
0x10f8   :  { %5029 = vmatpush3.bf16.msra.mxu0 %v5729_v37 }
0x10f9   :  { %5036 = vmatprep.subr.bf16.mxu0 %v5498_v0 }
0x10fa   :  { %5035 = vmatpush3.bf16.msra.mxu1 %v5736_v39  ;;  %v2638_v32 = vpop.permute.xlu1 %2637 }
0x10fb   :  { %4695 = vmatmul.mubr.msk.f32.vlgmr.msra.gmra.mrb[28].mxu0 %vm206_vm2, %v2638_v32  ;;  %5042 = vmatprep.subr.bf16.mxu1 %v5498_v0 }
0x10fc   :  { %5038 = vmatpush3.bf16.msra.mxu0 %v5630_v5  ;;  %4716 = vmatprep.mubr.msk.f32.mxu0 %vm5500_vm0, %v5499_v1 }
0x10fd   :  { %4706 = vmatmul.mubr.msk.f32.vlgmr.msra.gmra.mrb[28].mxu1 %vm206_vm2, %v2468_v29  ;;  %5039 = vmatprep.subr.bf16.mxu0 %v5498_v0 }
0x10fe   :  { %5044 = vmatpush3.bf16.msra.mxu1 %v5660_v30  ;;  %4727 = vmatprep.mubr.msk.f32.mxu1 %vm5500_vm0, %v5499_v1 }
0x10ff   :  { %5045 = vmatprep.subr.bf16.mxu1 %v5498_v0 }
0x1100   :  { %5041 = vmatpush3.bf16.msra.mxu0 %v5634_v9  ;;  %v6015_v9 = vld [vmem:[%s6201_s4 + $0x1] sm:$0x1] }
0x1101   :  { %5048 = vmatprep.subr.bf16.mxu0 %v5498_v0 }
0x1102   :  { %5047 = vmatpush3.bf16.msra.mxu1 %v5664_v33 }
0x1103   :  { %5054 = vmatprep.subr.bf16.mxu1 %v5498_v0 }
0x11c0   :  { %v2431_v5 = vpop.f32.mrb[24].mxu1 }
0x11c1   :  { %v2436_v35 = vrot.slane %v2431_v5, 2  ;;  %v4663_v36 = vpop.f32.mrb[25].mxu1 }
0x11c3   :  { %v2438_v11 = vadd.f32 %v2436_v35, %v5651_v13 }
0x11c5   :  { %5253 = vtanh.f32 %v2438_v11  ;;  %v4135_v58 = vmul.f32 -1.442695, %v2438_v11 }
0x11c6   :  { %v2537_v41 = vpop.f32.mrb[26].mxu0 }
0x11c7   :  { %v4674_v15 = vpop.f32.mrb[27].mxu0 }
0x11c8   :  { %v2607_v43 = vpop.f32.mrb[26].mxu1 }
0x11c9   :  { %v2608_v44 = vadd.f32 %v2607_v43, %v2537_v41  ;;  %v4685_v45 = vpop.f32.mrb[27].mxu1 }
0x11cb   :  { %v2611_v47 = vadd.f32 %v6015_v9, %v2608_v44 }
0x11cd   :  { %5255 = vtanh.f32 %v2611_v47  ;;  %v4138_v59 = vmul.f32 -1.442695, %v2611_v47 }
0x11ce   :  { %v2707_v48 = vpop.f32.mrb[28].mxu0 }
0x11cf   :  { %v5254_v49 = vpop.eup %5253  ;;  %v4696_v51 = vpop.f32.mrb[29].mxu0 }
0x11d0   :  { %v2777_v52 = vpop.f32.mrb[28].mxu1  ;;  %2451 = vrot.lane.b32.xlu0 %v5254_v49, %s5501_s21 }
0x11d1   :  { %v2778_v53 = vadd.f32 %v2777_v52, %v2707_v48  ;;  %v4707_v54 = vpop.f32.mrb[29].mxu1 }
0x11d3   :  { %v2781_v56 = vadd.f32 %v5764_v55, %v2778_v53 }
0x11d5   :  { %5257 = vtanh.f32 %v2781_v56  ;;  %v4141_v61 = vmul.f32 -1.442695, %v2781_v56 }
0x11d6   :  { %5259 = vpow2.f32 %v4135_v58 }
0x11d7   :  { %v5256_v31 = vpop.eup %5255  ;;  %5261 = vpow2.f32 %v4138_v59 }
0x11d8   :  { %2621 = vrot.lane.b32.xlu1 %v5256_v31, %s5501_s21  ;;  %5263 = vpow2.f32 %v4141_v61 }
0x11df   :  { %v5258_v57 = vpop.eup %5257 }
0x11e0   :  { %2791 = vrot.lane.b32.xlu0 %v5258_v57, %s5501_s21  ;;  %v5260_v40 = vpop.eup %5259 }
0x11e1   :  { %v2442_v63 = vadd.f32 1.0, %v5260_v40  ;;  %v5262_v2 = vpop.eup %5261 }
0x11e2   :  { %v2615_v3 = vadd.f32 1.0, %v5262_v2  ;;  %v5264_v55 = vpop.eup %5263 }
0x11e3   :  { %5265 = vrcp.f32 %v2442_v63  ;;  %v2785_v7 = vadd.f32 1.0, %v5264_v55 }
0x11e4   :  { %5267 = vrcp.f32 %v2615_v3 }
0x11e5   :  { %5269 = vrcp.f32 %v2785_v7 }
0x11ed   :  { %v5266_v4 = vpop.eup %5265 }
0x11ee   :  { %v5268_v8 = vpop.eup %5267  ;;  %v2449_v20 = vmul.f32 %v5266_v4, %v2447_v19 }
0x11ef   :  { %v5270_v16 = vpop.eup %5269  ;;  %v2619_v22 = vmul.f32 %v5268_v8, %v5963_v14 }
0x11f0   :  { %v2789_v25 = vmul.f32 %v5270_v16, %v5968_v60 }
0x1242   :  { %v2452_v6 = vpop.permute.xlu0 %2451 }
0x1243   :  { %v2454_v50 = vmul.f32 %v5266_v4, %v2452_v6 }
0x1245   :  { %2456 = vrot.lane.b32.xlu1 %v2454_v50, %s5501_s21 }
0x124a   :  { %v2622_v12 = vpop.permute.xlu1 %2621 }
0x124b   :  { %v2624_v26 = vmul.f32 %v5268_v8, %v2622_v12 }
0x124d   :  { %2626 = vrot.lane.b32.xlu0 %v2624_v26, %s5501_s21 }
0x1252   :  { %v2792_v17 = vpop.permute.xlu0 %2791 }
0x1253   :  { %v2794_v18 = vmul.f32 %v5270_v16, %v2792_v17 }
0x1255   :  { %2796 = vrot.lane.b32.xlu1 %v2794_v18, %s5501_s21 }
0x12b7   :  { %v2457_v62 = vpop.permute.xlu1 %2456 }
0x12b8   :  { %v6026_v21 = vadd.f32 %v2457_v62, %v2449_v20 }
0x12ba   :  { %5271 = vtanh.f32 %v6026_v21 }
0x12bf   :  { %v2627_v23 = vpop.permute.xlu0 %2626 }
0x12c0   :  { %v6030_v24 = vadd.f32 %v2627_v23, %v2619_v22  ;;  %v2894_v23 = vrot.slane %v6026_v21, 7 }
0x12c2   :  { %5273 = vtanh.f32 %v6030_v24 }
0x12c4   :  { %v5272_v46 = vpop.eup %5271 }
0x12c5   :  { %2462 = vrot.lane.b32.xlu0 %v5272_v46, %s5501_s21 }
0x12c7   :  { %v2797_v27 = vpop.permute.xlu1 %2796 }
0x12c8   :  { %v6035_v10 = vadd.f32 %v2797_v27, %v2789_v25 }
0x12ca   :  { %5275 = vtanh.f32 %v6035_v10 }
0x12cc   :  { %v5274_v29 = vpop.eup %5273 }
0x12cd   :  { %2632 = vrot.lane.b32.xlu1 %v5274_v29, %s5501_s21 }
0x12d4   :  { %v5276_v32 = vpop.eup %5275 }
0x12d5   :  { %2802 = vrot.lane.b32.xlu0 %v5276_v32, %s5501_s21 }
0x1337   :  { %v2463_v14 = vpop.permute.xlu0 %2462 }
0x1338   :  { %v2465_v5 = vmul.f32 %v5266_v4, %v2463_v14 }
0x133a   :  { %v2807_v35 = vrot.slane %v2465_v5, 6 }
0x133c   :  { %2808 = vrot.lane.b32.xlu1 %v2807_v35, %s5502_s23 }
0x133f   :  { %v2633_v36 = vpop.permute.xlu1 %2632 }
0x1340   :  { %v2635_v11 = vmul.f32 %v5268_v8, %v2633_v36 }
0x1342   :  { %2914 = vrot.lane.b32.xlu0 %v2635_v11, %s5502_s23 }
0x1347   :  { %v2803_v60 = vpop.permute.xlu0 %2802 }
0x1348   :  { %v2805_v41 = vmul.f32 %v5270_v16, %v2803_v60 }
0x134a   :  { %3084 = vrot.lane.b32.xlu1 %v2805_v41, %s5502_s23 }
0x13ae   :  { %v2809_v15 = vpop.permute.xlu1 %2808 }
0x13af   :  { %4717 = vmatmul.mubr.msk.f32.vlgmr.msra.gmra.mrb[30].mxu0 %vm206_vm2, %v2809_v15 }
0x13b0   :  { %5050 = vmatpush3.bf16.msra.mxu0 %v5676_v38  ;;  %4738 = vmatprep.mubr.msk.f32.mxu0 %vm5500_vm0, %v5499_v1 }
0x13b1   :  { %5051 = vmatprep.subr.bf16.mxu0 %v5498_v0 }
0x13b4   :  { %5053 = vmatpush3.bf16.msra.mxu0 %v5680_v42  ;;  %v2915_v43 = vpop.permute.xlu0 %2914 }
0x13b5   :  { %4728 = vmatmul.mubr.msk.f32.vlgmr.msra.gmra.mrb[30].mxu1 %vm206_vm2, %v2915_v43  ;;  %5060 = vmatprep.subr.bf16.mxu0 %v5498_v0 }
0x13b6   :  { %5056 = vmatpush3.bf16.msra.mxu1 %v5721_v28  ;;  %4749 = vmatprep.mubr.msk.f32.mxu1 %vm5500_vm0, %v5499_v1 }
0x13b7   :  { %4739 = vmatmul.mubr.msk.f32.vlgmr.msra.gmra.mrb[32].mxu0 %vm206_vm2, %v2809_v15  ;;  %5057 = vmatprep.subr.bf16.mxu1 %v5498_v0 }
0x13b8   :  { %5062 = vmatpush3.bf16.msra.mxu0 %v5724_v34  ;;  %4760 = vmatprep.mubr.msk.f32.mxu0 %vm5500_vm0, %v5499_v1 }
0x13b9   :  { %5063 = vmatprep.subr.bf16.mxu0 %v5498_v0 }
0x13ba   :  { %5059 = vmatpush3.bf16.msra.mxu1 %v5729_v37 }
0x13bb   :  { %5066 = vmatprep.subr.bf16.mxu1 %v5498_v0 }
0x13bc   :  { %5065 = vmatpush3.bf16.msra.mxu0 %v5736_v39  ;;  %v3085_v44 = vpop.permute.xlu1 %3084 }
0x13bd   :  { %4750 = vmatmul.mubr.msk.f32.vlgmr.msra.gmra.mrb[32].mxu1 %vm206_vm2, %v3085_v44  ;;  %5072 = vmatprep.subr.bf16.mxu0 %v5498_v0 }
0x13be   :  { %5068 = vmatpush3.bf16.msra.mxu1 %v5660_v30  ;;  %4771 = vmatprep.mubr.msk.f32.mxu1 %vm5500_vm0, %v5499_v1 }
0x13bf   :  { %4761 = vmatmul.mubr.msk.f32.vlgmr.msra.gmra.mrb[34].mxu0 %vm206_vm2, %v2915_v43  ;;  %5069 = vmatprep.subr.bf16.mxu1 %v5498_v0 }
0x13c0   :  { %5074 = vmatpush3.bf16.msra.mxu0 %v5676_v38  ;;  %4782 = vmatprep.mubr.msk.f32.mxu0 %vm5500_vm0, %v5499_v1 }
0x13c1   :  { %5075 = vmatprep.subr.bf16.mxu0 %v5498_v0 }
0x13c2   :  { %5071 = vmatpush3.bf16.msra.mxu1 %v5664_v33 }
0x13c3   :  { %5078 = vmatprep.subr.bf16.mxu1 %v5498_v0 }
0x13c4   :  { %5077 = vmatpush3.bf16.msra.mxu0 %v5680_v42 }
0x13c5   :  { %5084 = vmatprep.subr.bf16.mxu0 %v5498_v0 }
0x1482   :  { %v2878_v30 = vpop.f32.mrb[30].mxu0 }
0x1483   :  { %v2883_v45 = vrot.slane %v2878_v30, 1  ;;  %v4718_v47 = vpop.f32.mrb[31].mxu0 }
0x1485   :  { %v2885_v48 = vadd.f32 %v2883_v45, %v5651_v13  ;;  %v6084_v13 = vld [vmem:[%s6201_s4 + $0x2] sm:$0x1] }
0x1487   :  { %5277 = vtanh.f32 %v2885_v48  ;;  %v4143_v63 = vmul.f32 -1.442695, %v2885_v48 }
0x1488   :  { %v2984_v38 = vpop.f32.mrb[30].mxu1 }
0x1489   :  { %v4729_v49 = vpop.f32.mrb[31].mxu1 }
0x148a   :  { %v3054_v51 = vpop.f32.mrb[32].mxu0 }
0x148b   :  { %v3055_v52 = vadd.f32 %v3054_v51, %v2984_v38  ;;  %v4740_v53 = vpop.f32.mrb[33].mxu0 }
0x148d   :  { %v3058_v54 = vadd.f32 %v6015_v9, %v3055_v52 }
0x148f   :  { %5279 = vtanh.f32 %v3058_v54  ;;  %v4146_v2 = vmul.f32 -1.442695, %v3058_v54 }
0x1490   :  { %v3154_v33 = vpop.f32.mrb[32].mxu1 }
0x1491   :  { %v5278_v56 = vpop.eup %5277  ;;  %v4751_v31 = vpop.f32.mrb[33].mxu1 }
0x1492   :  { %v3224_v42 = vpop.f32.mrb[34].mxu0  ;;  %2898 = vrot.lane.b32.xlu0 %v5278_v56, %s5501_s21 }
0x1493   :  { %v3225_v57 = vadd.f32 %v3224_v42, %v3154_v33  ;;  %v4762_v58 = vpop.f32.mrb[35].mxu0 }
0x1495   :  { %v3228_v59 = vadd.f32 %v6084_v13, %v3225_v57 }
0x1497   :  { %5281 = vtanh.f32 %v3228_v59  ;;  %v4149_v55 = vmul.f32 -1.442695, %v3228_v59 }
0x1498   :  { %5283 = vpow2.f32 %v4143_v63 }
0x1499   :  { %v5280_v40 = vpop.eup %5279  ;;  %5285 = vpow2.f32 %v4146_v2 }
0x149a   :  { %3068 = vrot.lane.b32.xlu1 %v5280_v40, %s5501_s21  ;;  %5287 = vpow2.f32 %v4149_v55 }
0x14a1   :  { %v5282_v61 = vpop.eup %5281 }
0x14a2   :  { %3238 = vrot.lane.b32.xlu0 %v5282_v61, %s5501_s21  ;;  %v5284_v3 = vpop.eup %5283 }
0x14a3   :  { %v2889_v4 = vadd.f32 1.0, %v5284_v3  ;;  %v5286_v6 = vpop.eup %5285 }
0x14a4   :  { %v3062_v50 = vadd.f32 1.0, %v5286_v6  ;;  %v5288_v7 = vpop.eup %5287 }
0x14a5   :  { %5289 = vrcp.f32 %v2889_v4  ;;  %v3232_v16 = vadd.f32 1.0, %v5288_v7 }
0x14a6   :  { %5291 = vrcp.f32 %v3062_v50 }
0x14a7   :  { %5293 = vrcp.f32 %v3232_v16 }
0x14af   :  { %v5290_v8 = vpop.eup %5289 }
0x14b0   :  { %v5292_v17 = vpop.eup %5291  ;;  %v2896_v46 = vmul.f32 %v5290_v8, %v2894_v23 }
0x14b1   :  { %v5294_v20 = vpop.eup %5293  ;;  %v3066_v29 = vmul.f32 %v5292_v17, %v6030_v24 }
0x14b2   :  { %v3236_v35 = vmul.f32 %v5294_v20, %v6035_v10 }
0x1504   :  { %v2899_v12 = vpop.permute.xlu0 %2898 }
0x1505   :  { %v2901_v26 = vmul.f32 %v5290_v8, %v2899_v12 }
0x1507   :  { %2903 = vrot.lane.b32.xlu1 %v2901_v26, %s5501_s21 }
0x150c   :  { %v3069_v18 = vpop.permute.xlu1 %3068 }
0x150d   :  { %v3071_v19 = vmul.f32 %v5292_v17, %v3069_v18 }
0x150f   :  { %3073 = vrot.lane.b32.xlu0 %v3071_v19, %s5501_s21 }
0x1514   :  { %v3239_v62 = vpop.permute.xlu0 %3238 }
0x1515   :  { %v3241_v22 = vmul.f32 %v5294_v20, %v3239_v62 }
0x1517   :  { %3243 = vrot.lane.b32.xlu1 %v3241_v22, %s5501_s21 }
0x1579   :  { %v2904_v25 = vpop.permute.xlu1 %2903 }
0x157a   :  { %v2906_v27 = vadd.f32 %v2904_v25, %v2896_v46 }
0x157c   :  { %5295 = vtanh.f32 %v2906_v27 }
0x1581   :  { %v3074_v32 = vpop.permute.xlu0 %3073 }
0x1582   :  { %v6094_v14 = vadd.f32 %v3074_v32, %v3066_v29 }
0x1584   :  { %5297 = vtanh.f32 %v6094_v14 }
0x1586   :  { %v5296_v5 = vpop.eup %5295 }
0x1587   :  { %2909 = vrot.lane.b32.xlu0 %v5296_v5, %s5501_s21 }
0x1589   :  { %v3244_v36 = vpop.permute.xlu1 %3243 }
0x158a   :  { %v6099_v11 = vadd.f32 %v3244_v36, %v3236_v35 }
0x158c   :  { %5299 = vtanh.f32 %v6099_v11 }
0x158e   :  { %v5298_v21 = vpop.eup %5297 }
0x158f   :  { %3079 = vrot.lane.b32.xlu1 %v5298_v21, %s5501_s21 }
0x1596   :  { %v5300_v60 = vpop.eup %5299 }
0x1597   :  { %3249 = vrot.lane.b32.xlu0 %v5300_v60, %s5501_s21 }
0x15f9   :  { %v2910_v24 = vpop.permute.xlu0 %2909 }
0x15fa   :  { %v2912_v41 = vmul.f32 %v5290_v8, %v2910_v24 }
0x15fc   :  { %v3329_v15 = vrot.slane %v2912_v41, 7 }
0x15fe   :  { %3330 = vrot.lane.b32.xlu0 %v3329_v15, %s5502_s23 }
0x1601   :  { %v3080_v43 = vpop.permute.xlu1 %3079 }
0x1602   :  { %v3082_v44 = vmul.f32 %v5292_v17, %v3080_v43 }
0x1604   :  { %3254 = vrot.lane.b32.xlu1 %v3082_v44, %s5502_s23 }
0x1609   :  { %v3250_v10 = vpop.permute.xlu0 %3249 }
0x160a   :  { %v3252_v30 = vmul.f32 %v5294_v20, %v3250_v10  ;;  %v3774_v10 = vld [vmem:[#allocation8] sm:$0xff] }
0x160c   :  { %3430 = vrot.lane.b32.xlu1 %v3252_v30, %s5502_s23  ;;  %v3776_v30 = vld [vmem:[#allocation8 + $0x10] sm:$0xff] }
0x1670   :  { %v3331_v45 = vpop.permute.xlu0 %3330 }
0x1671   :  { %4783 = vmatmul.mubr.msk.f32.vlgmr.msra.gmra.mrb[36].mxu0 %vm206_vm2, %v3331_v45 }
0x1672   :  { %5086 = vmatpush3.bf16.msra.mxu0 %v5724_v34  ;;  %4804 = vmatprep.mubr.msk.f32.mxu0 %vm5500_vm0, %v5499_v1 }
0x1673   :  { %5087 = vmatprep.subr.bf16.mxu0 %v5498_v0 }
0x1676   :  { %v3255_v47 = vpop.permute.xlu1 %3254  ;;  %5089 = vmatpush3.bf16.msra.mxu0 %v5736_v39 }
0x1677   :  { %4772 = vmatmul.mubr.msk.f32.vlgmr.msra.gmra.mrb[34].mxu1 %vm206_vm2, %v3255_v47  ;;  %5096 = vmatprep.subr.bf16.mxu0 %v5498_v0 }
0x1678   :  { %5080 = vmatpush3.bf16.msra.mxu1 %v5721_v28  ;;  %4793 = vmatprep.mubr.msk.f32.mxu1 %vm5500_vm0, %v5499_v1 }
0x1679   :  { %4805 = vmatmul.mubr.msk.f32.vlgmr.msra.gmra.mrb[38].mxu0 %vm206_vm2, %v3255_v47  ;;  %5081 = vmatprep.subr.bf16.mxu1 %v5498_v0  ;;  %v3777_v47 = vld [vmem:[#allocation8 + $0x18] sm:$0xff] }
0x167a   :  { %5098 = vmatpush3.bf16.msra.mxu0 %v5724_v34  ;;  %4826 = vmatprep.mubr.msk.f32.mxu0 %vm5500_vm0, %v5499_v1 }
0x167b   :  { %5099 = vmatprep.subr.bf16.mxu0 %v5498_v0 }
0x167c   :  { %5083 = vmatpush3.bf16.msra.mxu1 %v5729_v37 }
0x167d   :  { %5090 = vmatprep.subr.bf16.mxu1 %v5498_v0 }
0x167e   :  { %v3431_v48 = vpop.permute.xlu1 %3430  ;;  %5101 = vmatpush3.bf16.msra.mxu0 %v5736_v39 }
0x167f   :  { %4794 = vmatmul.mubr.msk.f32.vlgmr.msra.gmra.mrb[36].mxu1 %vm206_vm2, %v3431_v48  ;;  %5108 = vmatprep.subr.bf16.mxu0 %v5498_v0  ;;  %v5106_v48 = vpack.c.bf16 %v3777_v47, %v3776_v30 }
0x1680   :  { %5092 = vmatpush3.bf16.msra.mxu1 %v5721_v28  ;;  %4815 = vmatprep.mubr.msk.f32.mxu1 %vm5500_vm0, %v5499_v1 }
0x1681   :  { %5093 = vmatprep.subr.bf16.mxu1 %v5498_v0 }
0x1684   :  { %5095 = vmatpush3.bf16.msra.mxu1 %v5729_v37 }
0x1685   :  { %5102 = vmatprep.subr.bf16.mxu1 %v5498_v0 }
0x1744   :  { %v3400_v34 = vpop.f32.mrb[36].mxu0 }
0x1745   :  { %v4784_v38 = vpop.f32.mrb[37].mxu0 }
0x174a   :  { %v3324_v49 = vpop.f32.mrb[34].mxu1 }
0x174b   :  { %v3401_v51 = vadd.f32 %v3400_v34, %v3324_v49  ;;  %v4773_v39 = vpop.f32.mrb[35].mxu1 }
0x174c   :  { %v3570_v52 = vpop.f32.mrb[38].mxu0  ;;  %v3778_v39 = vld [vmem:[%s6204_s7] sm:$0x1] }
0x174d   :  { %v3404_v53 = vadd.f32 %v6015_v9, %v3401_v51  ;;  %v4806_v54 = vpop.f32.mrb[39].mxu0 }
0x174f   :  { %5301 = vtanh.f32 %v3404_v53  ;;  %v4152_v57 = vmul.f32 -1.442695, %v3404_v53 }
0x1752   :  { %v3500_v28 = vpop.f32.mrb[36].mxu1 }
0x1753   :  { %v3571_v33 = vadd.f32 %v3570_v52, %v3500_v28  ;;  %v4795_v56 = vpop.f32.mrb[37].mxu1 }
0x1755   :  { %v3574_v31 = vadd.f32 %v6084_v13, %v3571_v33 }
0x1757   :  { %5303 = vtanh.f32 %v3574_v31  ;;  %v4155_v58 = vmul.f32 -1.442695, %v3574_v31 }
0x1758   :  { %5305 = vpow2.f32 %v4152_v57 }
0x1759   :  { %v5302_v42 = vpop.eup %5301  ;;  %5307 = vpow2.f32 %v4155_v58  ;;  %v3873_v58 = vld [vmem:[#allocation10 + $0x8] sm:$0xff] }
0x175a   :  { %3414 = vrot.lane.b32.xlu0 %v5302_v42, %s5501_s21 }
0x1761   :  { %v5304_v37 = vpop.eup %5303 }
0x1762   :  { %3584 = vrot.lane.b32.xlu1 %v5304_v37, %s5501_s21  ;;  %v5306_v59 = vpop.eup %5305 }
0x1763   :  { %v3408_v9 = vadd.f32 1.0, %v5306_v59  ;;  %v5308_v40 = vpop.eup %5307  ;;  %v3874_v59 = vld [vmem:[#allocation10 + $0x10] sm:$0xff] }
0x1764   :  { %v3578_v61 = vadd.f32 1.0, %v5308_v40  ;;  %v3875_v40 = vld [vmem:[#allocation10 + $0x18] sm:$0xff] }
0x1765   :  { %5309 = vrcp.f32 %v3408_v9 }
0x1766   :  { %5311 = vrcp.f32 %v3578_v61  ;;  %v5112_v61 = vpack.c.bf16 %v3875_v40, %v3874_v59 }
0x176f   :  { %v5310_v63 = vpop.eup %5309 }
0x1770   :  { %v5312_v55 = vpop.eup %5311  ;;  %v3412_v50 = vmul.f32 %v5310_v63, %v6094_v14 }
0x1771   :  { %v3582_v12 = vmul.f32 %v5312_v55, %v6099_v11 }
0x17cc   :  { %v3415_v2 = vpop.permute.xlu0 %3414 }
0x17cd   :  { %v3417_v3 = vmul.f32 %v5310_v63, %v3415_v2 }
0x17cf   :  { %3419 = vrot.lane.b32.xlu0 %v3417_v3, %s5501_s21 }
0x17d4   :  { %v3585_v4 = vpop.permute.xlu1 %3584 }
0x17d5   :  { %v3587_v6 = vmul.f32 %v5312_v55, %v3585_v4  ;;  %v4161_v4 = vld [vmem:[%s6204_s7 + $0x1] sm:$0x1] }
0x17d7   :  { %3589 = vrot.lane.b32.xlu1 %v3587_v6, %s5501_s21 }
0x1841   :  { %v3420_v7 = vpop.permute.xlu0 %3419 }
0x1842   :  { %v3422_v8 = vadd.f32 %v3420_v7, %v3412_v50 }
0x1844   :  { %5313 = vtanh.f32 %v3422_v8 }
0x1849   :  { %v3590_v26 = vpop.permute.xlu1 %3589 }
0x184a   :  { %v3592_v16 = vadd.f32 %v3590_v26, %v3582_v12 }
0x184c   :  { %5315 = vtanh.f32 %v3592_v16 }
0x184e   :  { %v5314_v17 = vpop.eup %5313 }
0x184f   :  { %3425 = vrot.lane.b32.xlu0 %v5314_v17, %s5501_s21 }
0x1856   :  { %v5316_v18 = vpop.eup %5315 }
0x1857   :  { %3595 = vrot.lane.b32.xlu1 %v5316_v18, %s5501_s21 }
0x18c1   :  { %v3426_v19 = vpop.permute.xlu0 %3425 }
0x18c2   :  { %v3428_v20 = vmul.f32 %v5310_v63, %v3426_v19 }
0x18c4   :  { %3675 = vrot.lane.b32.xlu1 %v3428_v20, %s5502_s23  ;;  %v3972_v20 = vld [vmem:[#allocation10 + $0x20] sm:$0xff] }
0x18c9   :  { %v3596_v62 = vpop.permute.xlu1 %3595 }
0x18ca   :  { %v3598_v22 = vmul.f32 %v5312_v55, %v3596_v62  ;;  %v3973_v62 = vld [vmem:[#allocation10 + $0x28] sm:$0xff] }
0x18cc   :  { %3600 = vrot.lane.b32.xlu0 %v3598_v22, %s5502_s23  ;;  %v3974_v22 = vld [vmem:[#allocation10 + $0x30] sm:$0xff] }
0x1936   :  { %v3676_v23 = vpop.permute.xlu1 %3675 }
0x1937   :  { %4827 = vmatmul.mubr.msk.f32.vlgmr.msra.gmra.mrb[40].mxu0 %vm206_vm2, %v3676_v23  ;;  %v5115_v23 = vpack.c.bf16 %v3973_v62, %v3972_v20 }
0x1938   :  { %4848 = vmatprep.mubr.msk.f32.mxu0 %vm5500_vm0, %v5499_v1 }
0x193e   :  { %v3601_v46 = vpop.permute.xlu0 %3600 }
0x193f   :  { %4816 = vmatmul.mubr.msk.f32.vlgmr.msra.gmra.mrb[38].mxu1 %vm206_vm2, %v3601_v46  ;;  %v3975_v46 = vld [vmem:[#allocation10 + $0x38] sm:$0xff] }
0x1940   :  { %4837 = vmatprep.mubr.msk.f32.mxu1 %vm5500_vm0, %v5499_v1 }
0x1a0a   :  { %v3745_v25 = vpop.f32.mrb[40].mxu0 }
0x1a0b   :  { %v4828_v27 = vpop.f32.mrb[41].mxu0 }
0x1a12   :  { %v3670_v29 = vpop.f32.mrb[38].mxu1 }
0x1a13   :  { %v3746_v32 = vadd.f32 %v3745_v25, %v3670_v29  ;;  %v4817_v14 = vpop.f32.mrb[39].mxu1  ;;  %v5118_v25 = vpack.c.bf16 %v3975_v46, %v3974_v22 }
0x1a15   :  { %v3749_v5 = vadd.f32 %v6084_v13, %v3746_v32  ;;  %v3775_v13 = vld [vmem:[#allocation8 + $0x8] sm:$0xff] }
0x1a16   :  { %v5103_v45 = vpack.c.bf16 %v3775_v13, %v3774_v10 }
0x1a17   :  { %5317 = vtanh.f32 %v3749_v5  ;;  %v4158_v36 = vmul.f32 -1.442695, %v3749_v5  ;;  %v4164_v5 = vld [vmem:[%s6204_s7 + $0x2] sm:$0x1]  ;;  %s5503_s7 = smov [#allocation11]  }
0x1a18   :  { %5104 = vmatpush3.bf16.msra.mxu1 %v5103_v45  ;;  %s4083_s12 = sshll.u32 %s5503_s7, 4  ;;  %s4084_s12 = int_to_ptr.vmem [resolvable:$true] %s4083_s12 }
0x1a19   :  { %5319 = vpow2.f32 %v4158_v36  ;;  %5105 = vmatprep.subr.bf16.mxu1 %v5498_v0  ;;  %s5461_s13 = scalar_lea.vmem %s4084_s12, 16  ;;  %s5465_s14 = scalar_lea.vmem %s4084_s12, 32 }
0x1a1a   :  { %p5462_p12 = scmp.ne.s32.totalorder %s4084_s12, %s5461_s13  ;;  %p5466_p13 = scmp.lt.s32.totalorder %s4084_s12, %s4084_s12 }
0x1a1b   :  { %p5467_p0 = scmp.lt.s32.totalorder %s5465_s14, %s5461_s13 }
0x1a1c   :  { %5107 = vmatpush3.bf16.msra.mxu1 %v5106_v48 }
0x1a1d   :  { %5114 = vmatprep.subr.bf16.mxu1 %v5498_v0  ;;  %p5468_p1 = por %p5467_p0, %p5466_p13 }
0x1a1f   :  { %p5469_p2 = pnand %p5468_p1, %p5462_p12 }
0x1a21   :  { %v5318_v35 = vpop.eup %5317 }
0x1a22   :  { %3759 = vrot.lane.b32.xlu0 %v5318_v35, %s5501_s21 }
0x1a23   :  { %v5320_v11 = vpop.eup %5319 }
0x1a24   :  { %v3753_v21 = vadd.f32 1.0, %v5320_v11 }
0x1a26   :  { %5321 = vrcp.f32 %v3753_v21 }
0x1a30   :  { %v5322_v60 = vpop.eup %5321 }
0x1a31   :  { %v3757_v15 = vmul.f32 %v5322_v60, %v3592_v16 }
0x1a94   :  { %v3760_v24 = vpop.permute.xlu0 %3759 }
0x1a95   :  { %v3762_v41 = vmul.f32 %v5322_v60, %v3760_v24 }
0x1a97   :  { %3764 = vrot.lane.b32.xlu1 %v3762_v41, %s5501_s21 }
0x1b09   :  { %v3765_v43 = vpop.permute.xlu1 %3764 }
0x1b0a   :  { %v3767_v44 = vadd.f32 %v3765_v43, %v3757_v15 }
0x1b0c   :  { %5323 = vtanh.f32 %v3767_v44 }
0x1b16   :  { %v5324_v34 = vpop.eup %5323 }
0x1b17   :  { %3770 = vrot.lane.b32.xlu0 %v5324_v34, %s5501_s21 }
0x1b89   :  { %v3771_v38 = vpop.permute.xlu0 %3770 }
0x1b8a   :  { %v3773_v49 = vmul.f32 %v5322_v60, %v3771_v38 }
0x1b8c   :  { %3780 = vrot.lane.b32.xlu1 %v3773_v49, %s5502_s23 }
0x1bfe   :  { %v3781_v51 = vpop.permute.xlu1 %3780 }
0x1bff   :  { %4838 = vmatmul.mubr.msk.f32.vlgmr.msra.gmra.mrb[40].mxu1 %vm206_vm2, %v3781_v51 }
0x1c00   :  { %4859 = vmatprep.mubr.msk.f32.mxu1 %vm5500_vm0, %v5499_v1  ;;  %v3872_v1 = vld [vmem:[#allocation10] sm:$0xff]  ;;  %5116 = vmatpush3.bf16.msra.mxu1 %v5115_v23 }
0x1c01   :  { %v5109_v9 = vpack.c.bf16 %v3873_v58, %v3872_v1  ;;  %5117 = vmatprep.subr.bf16.mxu1 %v5498_v0 }
0x1c03   :  { %5110 = vmatpush3.bf16.msra.mxu0 %v5109_v9 }
0x1c04   :  { %5111 = vmatprep.subr.bf16.mxu0 %v5498_v0  ;;  %5119 = vmatpush3.bf16.msra.mxu1 %v5118_v25 }
0x1c07   :  { %5113 = vmatpush3.bf16.msra.mxu0 %v5112_v61 }
0x1cd2   :  { %v3850_v52 = vpop.f32.mrb[40].mxu1 }
0x1cd3   :  { %v3851_v53 = vadd.f32 %v3850_v52, %v3778_v39  ;;  %v4839_v54 = vpop.f32.mrb[41].mxu1 }
0x1cd5   :  { %5325 = vtanh.f32 %v3851_v53  ;;  %v4160_v33 = vmul.f32 -1.442695, %v3851_v53 }
0x1cd7   :  { %5327 = vpow2.f32 %v4160_v33 }
0x1cdf   :  { %v5326_v28 = vpop.eup %5325 }
0x1ce0   :  { %3862 = vrot.lane.b32.xlu0 %v5326_v28, %s5501_s21 }
0x1ce1   :  { %v5328_v56 = vpop.eup %5327 }
0x1ce2   :  { %v3857_v31 = vadd.f32 1.0, %v5328_v56 }
0x1ce4   :  { %5329 = vrcp.f32 %v3857_v31 }
0x1cee   :  { %v5330_v42 = vpop.eup %5329 }
0x1d52   :  { %v3863_v37 = vpop.permute.xlu0 %3862 }
0x1d53   :  { %v3865_v57 = vmul.f32 %v5330_v42, %v3863_v37 }
0x1d55   :  { %5331 = vtanh.f32 %v3865_v57 }
0x1d5f   :  { %v5332_v63 = vpop.eup %5331 }
0x1d60   :  { %3868 = vrot.lane.b32.xlu1 %v5332_v63, %s5502_s23 }
0x1dd2   :  { %v3869_v2 = vpop.permute.xlu1 %3868 }
0x1dd3   :  { %v3871_v3 = vmul.f32 %v5330_v42, %v3869_v2 }
0x1dd5   :  { %3879 = vrot.lane.b32.xlu0 %v3871_v3, %s5502_s23 }
0x1e47   :  { %v3880_v55 = vpop.permute.xlu0 %3879 }
0x1e48   :  { %4849 = vmatmul.mubr.msk.f32.vlgmr.msra.gmra.mrb[42].mxu0 %vm206_vm2, %v3880_v55 }
0x1f1b   :  { %v3949_v6 = vpop.f32.mrb[42].mxu0 }
0x1f1c   :  { %v3950_v50 = vadd.f32 %v4161_v4, %v3949_v6  ;;  %v4850_v7 = vpop.f32.mrb[43].mxu0 }
0x1f1e   :  { %5333 = vtanh.f32 %v3950_v50  ;;  %v4163_v12 = vmul.f32 -1.442695, %v3950_v50 }
0x1f20   :  { %5335 = vpow2.f32 %v4163_v12 }
0x1f28   :  { %v5334_v8 = vpop.eup %5333 }
0x1f29   :  { %3961 = vrot.lane.b32.xlu1 %v5334_v8, %s5501_s21 }
0x1f2a   :  { %v5336_v26 = vpop.eup %5335 }
0x1f2b   :  { %v3956_v16 = vadd.f32 1.0, %v5336_v26 }
0x1f2d   :  { %5337 = vrcp.f32 %v3956_v16 }
0x1f37   :  { %v5338_v17 = vpop.eup %5337 }
0x1f9b   :  { %v3962_v18 = vpop.permute.xlu1 %3961 }
0x1f9c   :  { %v3964_v19 = vmul.f32 %v5338_v17, %v3962_v18 }
0x1f9e   :  { %5339 = vtanh.f32 %v3964_v19 }
0x1fa8   :  { %v5340_v27 = vpop.eup %5339 }
0x1fa9   :  { %3967 = vrot.lane.b32.xlu0 %v5340_v27, %s5502_s23 }
0x201b   :  { %v3968_v29 = vpop.permute.xlu0 %3967 }
0x201c   :  { %v3970_v32 = vmul.f32 %v5338_v17, %v3968_v29 }
0x201e   :  { %3979 = vrot.lane.b32.xlu1 %v3970_v32, %s5502_s23 }
0x2090   :  { %v3980_v14 = vpop.permute.xlu1 %3979 }
0x2091   :  { %4860 = vmatmul.mubr.msk.f32.vlgmr.msra.gmra.mrb[42].mxu1 %vm206_vm2, %v3980_v14 }
0x2164   :  { %v4049_v35 = vpop.f32.mrb[42].mxu1 }
0x2165   :  { %v4050_v36 = vadd.f32 %v4164_v5, %v4049_v35  ;;  %v4861_v11 = vpop.f32.mrb[43].mxu1 }
0x2167   :  { %5341 = vtanh.f32 %v4050_v36  ;;  %v4166_v21 = vmul.f32 -1.442695, %v4050_v36 }
0x2169   :  { %5343 = vpow2.f32 %v4166_v21 }
0x2171   :  { %v5342_v0 = vpop.eup %5341 }
0x2172   :  { %4061 = vrot.lane.b32.xlu0 %v5342_v0, %s5501_s21 }
0x2173   :  { %v5344_v60 = vpop.eup %5343 }
0x2174   :  { %v4056_v24 = vadd.f32 1.0, %v5344_v60 }
0x2176   :  { %5345 = vrcp.f32 %v4056_v24 }
0x2180   :  { %v5346_v41 = vpop.eup %5345 }
0x21e4   :  { %v4062_v15 = vpop.permute.xlu0 %4061 }
0x21e5   :  { %v4064_v43 = vmul.f32 %v5346_v41, %v4062_v15 }
0x21e7   :  { %5347 = vtanh.f32 %v4064_v43 }
0x21f1   :  { %v5348_v44 = vpop.eup %5347 }
0x21f2   :  { %4067 = vrot.lane.b32.xlu1 %v5348_v44, %s5502_s23 }
0x2264   :  { %v4068_v10 = vpop.permute.xlu1 %4067 }
0x2265   :  { %v4070_v13 = vmul.f32 %v5346_v41, %v4068_v10 }
0x2267   :  { %4072 = vrot.lane.b32.xlu0 %v4070_v13, %s5502_s23 }
0x22d9   :  { %v4073_v30 = vpop.permute.xlu0 %4072 }
0x22da   :  { %4076 = vst.msk [vmem:[#allocation11] sm:$0x1] %vm4075_vm3, %v4073_v30 }
0x22db   :  { %5472 = shalt.err (!%p5469_p2)
}
0x22dc   :  { %s5473_s19 = scalar_lea.hbm %s6205_s8, 16 }
0x22dd   :  { %p5474_p3 = scmp.ne.s32.totalorder %s6205_s8, %s5473_s19  ;;  %p5477_p4 = scmp.lt.u32.totalorder %s5473_s19, %s6205_s8 }
0x22df   :  { %p5479_p5 = pnand %p5477_p4, %p5474_p3 }
0x22e1   :  { %5482 = shalt.err (!%p5479_p5)
}
0x22e2   :  { %4086 = dma.vmem_to_hbm [thread:$0]  %s4084_s12, 16, %s6205_s8, [#allocation4]  }
0x22e3   :  { %5489 = dma.done.wait [#allocation4], 16  }
0x22e4   :  { %5490 = vsyncadd [#allocation4], 4294967280 }
0x22e5   :  { %4090 = vsyncpa [#allocation3], 1 }
0x22e6   :  { %4091 = vsyncpa [#allocation6], 1 }
0x22e7   :  { %4092 = vsyncpa [#allocation9], 1 }
0x22e8   :  { %4093 = vsyncpa [#allocation4], 1 }

</bundles_post_ra>
